<compile_context>
chip_gen: v7x
topology: tpu7x:2x2x1
jax: 0.10.0
libtpu: 0.0.40
codegen_flags: <defaults>
</compile_context>

<pallas_src>
import functools
import math

import jax
import jax.numpy as jnp
from jax.experimental import pallas as pl
from jax.experimental.pallas import tpu as pltpu


# ----------------------------------------------------------------------------
# Kernel: one (batch, query-row-tile) grid step of the full encoder layer.
#   srcq : (TQ, D)    fp32 query rows (residual / LN path)
#   qkf  : (S, D)     bf16 src+pos full sequence (Q rows via slice, K source)
#   xf   : (S, D)     bf16 src full sequence (V source)
#   K/V head-major bf16 scratch is filled once per batch at qi == 0.
# ----------------------------------------------------------------------------
def encoder_layer_kernel(srcq_ref, qkf_ref, xf_ref,
                         wq_ref, wk_ref, wv_ref, bq_ref, bk_ref, bv_ref,
                         wo_ref, bo_ref, w1_ref, b1_ref, w2_ref, b2_ref,
                         g1_ref, be1_ref, g2_ref, be2_ref,
                         out_ref, k_scr, v_scr, *, num_heads, eps, valid_len):
    f32, bf16 = jnp.float32, jnp.bfloat16
    tq, d_model = srcq_ref.shape
    seq = qkf_ref.shape[0]
    hd = d_model // num_heads
    qi = pl.program_id(1)

    # ---- once per batch: full-width K/V projections -> head-major bf16 scratch
    @pl.when(qi == 0)
    def _():
        k = jnp.dot(qkf_ref[...], wk_ref[...],
                    preferred_element_type=f32) + bk_ref[...]          # (S, D)
        v = jnp.dot(xf_ref[...], wv_ref[...],
                    preferred_element_type=f32) + bv_ref[...]          # (S, D)
        k_scr[...] = jnp.transpose(
            k.astype(bf16).reshape(seq, num_heads, hd), (1, 0, 2))     # (H, S, hd)
        v_scr[...] = jnp.transpose(
            v.astype(bf16).reshape(seq, num_heads, hd), (1, 0, 2))     # (H, S, hd)

    # ---- Q projection for this query tile (scale folded into wq/bq) --------
    row0 = pl.multiple_of(qi * tq, tq)
    qk_rows = qkf_ref[pl.ds(row0, tq), :]                              # (TQ, D) bf16
    q = jnp.dot(qk_rows, wq_ref[...],
                preferred_element_type=f32) + bq_ref[...]              # (TQ, D)
    q = jnp.transpose(q.astype(bf16).reshape(tq, num_heads, hd),
                      (1, 0, 2))                                       # (H, TQ, hd)

    # ---- attention (scores/softmax in fp32, MXU operands in bf16) ----------
    s = jnp.einsum("hqe,hke->hqk", q, k_scr[...],
                   preferred_element_type=f32)                         # (H, TQ, S)
    if valid_len < seq:   # static branch: mask padded keys
        kidx = jax.lax.broadcasted_iota(jnp.int32, s.shape, 2)
        s = jnp.where(kidx < valid_len, s, -1e30)
    s = s - jnp.max(s, axis=-1, keepdims=True)
    p = jnp.exp(s)
    p = p * pl.reciprocal(jnp.sum(p, axis=-1, keepdims=True), approx=True)
    o = jnp.einsum("hqk,hke->hqe", p.astype(bf16), v_scr[...],
                   preferred_element_type=f32)                         # (H, TQ, hd)

    # ---- output projection: head merge + single full-width matmul ----------
    o = jnp.transpose(o.astype(bf16), (1, 0, 2)).reshape(tq, d_model)  # (TQ, D)
    attn = jnp.dot(o, wo_ref[...], preferred_element_type=f32) + bo_ref[...]

    # ---- residual + LayerNorm1 (fp32 statistics) ----------------------------
    y = srcq_ref[...].astype(f32) + attn
    mu = jnp.mean(y, axis=-1, keepdims=True)
    var = jnp.mean(jnp.square(y - mu), axis=-1, keepdims=True)
    y = (y - mu) * jax.lax.rsqrt(var + eps) * g1_ref[...] + be1_ref[...]

    # ---- feed-forward: linear1 -> relu -> linear2 (bf16 MXU, fp32 accum) ----
    h1 = jnp.dot(y.astype(bf16), w1_ref[...],
                 preferred_element_type=f32) + b1_ref[...]
    h1 = jnp.maximum(h1, 0.0)
    h2 = jnp.dot(h1.astype(bf16), w2_ref[...],
                 preferred_element_type=f32) + b2_ref[...]

    # ---- residual + LayerNorm2 ----------------------------------------------
    z = y + h2
    mu2 = jnp.mean(z, axis=-1, keepdims=True)
    var2 = jnp.mean(jnp.square(z - mu2), axis=-1, keepdims=True)
    z = (z - mu2) * jax.lax.rsqrt(var2 + eps) * g2_ref[...] + be2_ref[...]

    out_ref[...] = z.astype(out_ref.dtype)


# ----------------------------------------------------------------------------
# Host-side parameter packing: bf16 matmul weights, fp32 biases/LN params,
# 1/sqrt(head_dim) folded into the Q projection.
# ----------------------------------------------------------------------------
_PARAM_ORDER = ("wq", "wk", "wv", "bq", "bk", "bv", "wo", "bo",
                "w1", "b1", "w2", "b2", "g1", "be1", "g2", "be2")


def pack_params(params, num_heads):
    d_model = params["wq"].shape[0]
    hd = d_model // num_heads
    scale = 1.0 / math.sqrt(hd)
    bf16, f32 = jnp.bfloat16, jnp.float32

    def bias(b):
        return jnp.asarray(b, f32).reshape(1, -1)

    return {
        "wq": (jnp.asarray(params["wq"], f32) * scale).astype(bf16),
        "wk": jnp.asarray(params["wk"]).astype(bf16),
        "wv": jnp.asarray(params["wv"]).astype(bf16),
        "bq": bias(params["bq"]) * scale,
        "bk": bias(params["bk"]),
        "bv": bias(params["bv"]),
        "wo": jnp.asarray(params["wo"]).astype(bf16),
        "bo": bias(params["bo"]),
        "w1": jnp.asarray(params["w1"]).astype(bf16),
        "b1": bias(params["b1"]),
        "w2": jnp.asarray(params["w2"]).astype(bf16),
        "b2": bias(params["b2"]),
        "g1": bias(params["g1"]), "be1": bias(params["be1"]),
        "g2": bias(params["g2"]), "be2": bias(params["be2"]),
    }


# ----------------------------------------------------------------------------
# Generation-aware knobs + one-time Buffered(1) capability probe.
# ----------------------------------------------------------------------------
def _tpu_vmem_bytes():
    try:
        info = pltpu.get_tpu_info()
        for attr in ("vmem_capacity_bytes", "vmem_bytes", "vmem_size_bytes"):
            v = getattr(info, attr, None)
            if v:
                return int(v)
    except Exception:
        pass
    return 128 * 1024 * 1024


def _pick_vmem_limit():
    # Leave ~25% of physical VMEM as headroom (v7x: 48 MiB, v5e/v6e: 96 MiB).
    return min(96 * 1024 * 1024, int(_tpu_vmem_bytes() * 3 // 4))


def _pick_q_tile(seq):
    """Return (q_tile, padded_seq)."""
    cap = 128 if _tpu_vmem_bytes() <= 64 * 1024 * 1024 else 256
    for t in (cap, 128):
        if seq >= t and seq % t == 0:
            return t, seq
    if seq <= 128:
        return seq, seq                       # tiny sequences: one tile/batch
    seq_pad = ((seq + 127) // 128) * 128      # pad + mask instead of TQ=S
    return 128, seq_pad


@functools.lru_cache(maxsize=None)
def _single_buffer_supported():
    """Cached one-time probe: can constant-index blocks use pl.Buffered(1)?"""
    if not hasattr(pl, "Buffered"):
        return False
    try:
        def _probe(x_ref, o_ref):
            o_ref[...] = x_ref[...] + 1.0
        fn = pl.pallas_call(
            _probe,
            out_shape=jax.ShapeDtypeStruct((8, 128), jnp.float32),
            grid=(1,),
            in_specs=[pl.BlockSpec((8, 128), lambda i: (0, 0),
                                   pipeline_mode=pl.Buffered(1))],
            out_specs=pl.BlockSpec((8, 128), lambda i: (0, 0)),
        )
        jax.jit(fn).lower(jnp.zeros((8, 128), jnp.float32)).compile()
        return True
    except Exception:
        return False


# ----------------------------------------------------------------------------
# pallas_call construction.
# ----------------------------------------------------------------------------
def _build_encoder_call(batch, seq_pad, d_model, tq, weight_shapes, out_dtype,
                        num_heads, eps, valid_len):
    grid = (batch, seq_pad // tq)
    single = _single_buffer_supported()
    buf1 = {"pipeline_mode": pl.Buffered(1)} if single else {}

    def const_spec(shape):
        n = len(shape)
        return pl.BlockSpec(shape, lambda b, qi, _n=n: (0,) * _n, **buf1)

    def fullseq_spec():
        # Block index only changes with the batch axis -> single buffer is
        # enough; the DMA amortizes over all qi steps of that batch.
        return pl.BlockSpec((None, seq_pad, d_model),
                            lambda b, qi: (b, 0, 0), **buf1)

    in_specs = [
        pl.BlockSpec((None, tq, d_model), lambda b, qi: (b, qi, 0)),  # srcq fp32
        fullseq_spec(),                                               # src+pos bf16
        fullseq_spec(),                                               # src bf16 (V)
    ] + [const_spec(s) for s in weight_shapes]

    out_spec = pl.BlockSpec((None, tq, d_model), lambda b, qi: (b, qi, 0))

    hd = d_model // num_heads
    scratch = [pltpu.VMEM((num_heads, seq_pad, hd), jnp.bfloat16),  # K
               pltpu.VMEM((num_heads, seq_pad, hd), jnp.bfloat16)]  # V

    kernel = functools.partial(encoder_layer_kernel, num_heads=num_heads,
                               eps=eps, valid_len=valid_len)

    return pl.pallas_call(
        kernel,
        out_shape=jax.ShapeDtypeStruct((batch, seq_pad, d_model), out_dtype),
        grid=grid,
        in_specs=in_specs,
        out_specs=out_spec,
        scratch_shapes=scratch,
        compiler_params=pltpu.CompilerParams(
            # qi axis is "arbitrary": K/V scratch filled at qi==0 is reused
            # by later qi steps of the same batch.
            dimension_semantics=("parallel", "arbitrary"),
            vmem_limit_bytes=_pick_vmem_limit(),
        ),
    )


def transformer_encoder_layer(src, pos, params, *, num_heads, eps=1e-5):
    """src, pos: (seq, batch, d_model) -- PyTorch batch_first=False layout."""
    seq, batch, d_model = src.shape
    if d_model % num_heads:
        raise ValueError("d_model must be divisible by num_heads")

    packed = pack_params(params, num_heads)
    weight_args = [packed[k] for k in _PARAM_ORDER]
    weight_shapes = [w.shape for w in weight_args]

    src_b = jnp.transpose(src, (1, 0, 2)).astype(jnp.float32)   # (B, S, D)
    pos_b = jnp.transpose(pos, (1, 0, 2)).astype(jnp.float32)

    tq, seq_pad = _pick_q_tile(seq)
    if seq_pad != seq:
        padw = ((0, 0), (0, seq_pad - seq), (0, 0))
        src_b = jnp.pad(src_b, padw)
        pos_b = jnp.pad(pos_b, padw)

    # Pre-add src+pos and pre-cast the big full-sequence streams to bf16.
    qk_b = (src_b + pos_b).astype(jnp.bfloat16)    # Q rows + K source
    x_b = src_b.astype(jnp.bfloat16)               # V source
    srcq = src_b                                   # fp32 residual / LN path

    call = _build_encoder_call(batch, seq_pad, d_model, tq, weight_shapes,
                               src.dtype, num_heads, eps, seq)
    out = call(srcq, qk_b, x_b, *weight_args)      # (B, S_pad, D)
    out = out[:, :seq]
    return jnp.transpose(out, (1, 0, 2))           # back to (S, B, D)


# ----------------------------------------------------------------------------
# Pure-JAX fp32 reference (eval-mode PyTorch semantics) for the sanity check.
# ----------------------------------------------------------------------------
def reference(src, pos, params, *, num_heads, eps=1e-5):
    S, B, D = src.shape
    hd = D // num_heads
    x = src.astype(jnp.float32)
    qk = x + pos.astype(jnp.float32)

    q = qk @ params["wq"] + params["bq"]
    k = qk @ params["wk"] + params["bk"]
    v = x @ params["wv"] + params["bv"]

    q = q.reshape(S, B, num_heads, hd) * (hd ** -0.5)
    k = k.reshape(S, B, num_heads, hd)
    v = v.reshape(S, B, num_heads, hd)
    scores = jnp.einsum("sbhd,tbhd->bhst", q, k)
    p = jax.nn.softmax(scores, axis=-1)
    o = jnp.einsum("bhst,tbhd->sbhd", p, v).reshape(S, B, D)
    attn = o @ params["wo"] + params["bo"]

    def ln(t, g, b):
        mu = jnp.mean(t, axis=-1, keepdims=True)
        var = jnp.mean((t - mu) ** 2, axis=-1, keepdims=True)
        return (t - mu) * jax.lax.rsqrt(var + eps) * g + b

    y = ln(x + attn, params["g1"], params["be1"])
    h = jnp.maximum(y @ params["w1"] + params["b1"], 0.0)
    h = h @ params["w2"] + params["b2"]
    return ln(y + h, params["g2"], params["be2"])


# ----------------------------------------------------------------------------
def init_params(key, d_model, nhead, dim_feedforward):
    ks = jax.random.split(key, 8)
    s = 0.05

    def rnd(k, shape):
        return jax.random.normal(k, shape, jnp.float32) * s

    D, F = d_model, dim_feedforward
    return {
        # attention in-projection (x @ W convention)
        "wq": rnd(ks[0], (D, D)), "wk": rnd(ks[1], (D, D)), "wv": rnd(ks[2], (D, D)),
        "bq": rnd(ks[3], (1, D)), "bk": rnd(ks[4], (1, D)), "bv": rnd(ks[5], (1, D)),
        # attention out-projection
        "wo": rnd(ks[6], (D, D)), "bo": jnp.zeros((1, D), jnp.float32),
        # feed-forward
        "w1": rnd(ks[7], (D, F)), "b1": jnp.zeros((1, F), jnp.float32),
        "w2": rnd(jax.random.fold_in(key, 99), (F, D)), "b2": jnp.zeros((1, D), jnp.float32),
        # layer norms
        "g1": jnp.ones((1, D), jnp.float32), "be1": jnp.zeros((1, D), jnp.float32),
        "g2": jnp.ones((1, D), jnp.float32), "be2": jnp.zeros((1, D), jnp.float32),
    }


if __name__ == "__main__":
    S, B, D, H, FF = 8, 2, 32, 4, 64   # seq, batch, d_model, nhead, dim_feedforward

    key = jax.random.PRNGKey(0)
    k_src, k_pos, k_par = jax.random.split(key, 3)
    src = jax.random.normal(k_src, (S, B, D), jnp.float32)
    pos = jax.random.normal(k_pos, (S, B, D), jnp.float32)
    params = init_params(k_par, D, H, FF)

    out = transformer_encoder_layer(src, pos, params, num_heads=H)
    out = jax.block_until_ready(out)

    ref = jax.block_until_ready(reference(src, pos, params, num_heads=H))
    assert out.shape == (S, B, D)
    max_err = jnp.max(jnp.abs(out - ref))
    # bf16 MXU operands vs. the fp32 reference -> tolerance loosened vs. pure fp32.
    assert jnp.allclose(out, ref, atol=2e-2, rtol=2e-2), (
        f"kernel / reference mismatch, max abs err = {max_err}")

    print("KERNEL_OK")
</pallas_src>

<mosaic_0001>
module attributes {stable_mosaic.version = 11 : i64} {
  func.func @encoder_layer_kernel(%arg0: i32, %arg1: i32, %arg2: memref<1x8x32xf32, #tpu.memory_space<vmem>>, %arg3: memref<1x8x32xbf16, #tpu.memory_space<vmem>>, %arg4: memref<1x8x32xbf16, #tpu.memory_space<vmem>>, %arg5: memref<32x32xbf16, #tpu.memory_space<vmem>>, %arg6: memref<32x32xbf16, #tpu.memory_space<vmem>>, %arg7: memref<32x32xbf16, #tpu.memory_space<vmem>>, %arg8: memref<1x32xf32, #tpu.memory_space<vmem>>, %arg9: memref<1x32xf32, #tpu.memory_space<vmem>>, %arg10: memref<1x32xf32, #tpu.memory_space<vmem>>, %arg11: memref<32x32xbf16, #tpu.memory_space<vmem>>, %arg12: memref<1x32xf32, #tpu.memory_space<vmem>>, %arg13: memref<32x64xbf16, #tpu.memory_space<vmem>>, %arg14: memref<1x64xf32, #tpu.memory_space<vmem>>, %arg15: memref<64x32xbf16, #tpu.memory_space<vmem>>, %arg16: memref<1x32xf32, #tpu.memory_space<vmem>>, %arg17: memref<1x32xf32, #tpu.memory_space<vmem>>, %arg18: memref<1x32xf32, #tpu.memory_space<vmem>>, %arg19: memref<1x32xf32, #tpu.memory_space<vmem>>, %arg20: memref<1x32xf32, #tpu.memory_space<vmem>>, %arg21: memref<1x8x32xf32, #tpu.memory_space<vmem>>, %arg22: memref<4x8x8xbf16, #tpu.memory_space<vmem>>, %arg23: memref<4x8x8xbf16, #tpu.memory_space<vmem>>) attributes {dimension_semantics = [#tpu.dimension_semantics<parallel>, #tpu.dimension_semantics<arbitrary>], iteration_bounds = array<i64: 2, 1>, scalar_prefetch = 0 : i64, scratch_operands = 2 : i64, tpu.core_type = #tpu.core_type<tc>, window_params = [{transform_indices = @transform_0, window_bounds = array<i64: 1, 8, 32>}, {transform_indices = @transform_1, window_bounds = array<i64: 1, 8, 32>}, {transform_indices = @transform_2, window_bounds = array<i64: 1, 8, 32>}, {pipeline_mode = #tpu.pipeline_mode<synchronous>, transform_indices = @transform_3, window_bounds = array<i64: 32, 32>}, {pipeline_mode = #tpu.pipeline_mode<synchronous>, transform_indices = @transform_4, window_bounds = array<i64: 32, 32>}, {pipeline_mode = #tpu.pipeline_mode<synchronous>, transform_indices = @transform_5, window_bounds = array<i64: 32, 32>}, {pipeline_mode = #tpu.pipeline_mode<synchronous>, transform_indices = @transform_6, window_bounds = array<i64: 1, 32>}, {pipeline_mode = #tpu.pipeline_mode<synchronous>, transform_indices = @transform_7, window_bounds = array<i64: 1, 32>}, {pipeline_mode = #tpu.pipeline_mode<synchronous>, transform_indices = @transform_8, window_bounds = array<i64: 1, 32>}, {pipeline_mode = #tpu.pipeline_mode<synchronous>, transform_indices = @transform_9, window_bounds = array<i64: 32, 32>}, {pipeline_mode = #tpu.pipeline_mode<synchronous>, transform_indices = @transform_10, window_bounds = array<i64: 1, 32>}, {pipeline_mode = #tpu.pipeline_mode<synchronous>, transform_indices = @transform_11, window_bounds = array<i64: 32, 64>}, {pipeline_mode = #tpu.pipeline_mode<synchronous>, transform_indices = @transform_12, window_bounds = array<i64: 1, 64>}, {pipeline_mode = #tpu.pipeline_mode<synchronous>, transform_indices = @transform_13, window_bounds = array<i64: 64, 32>}, {pipeline_mode = #tpu.pipeline_mode<synchronous>, transform_indices = @transform_14, window_bounds = array<i64: 1, 32>}, {pipeline_mode = #tpu.pipeline_mode<synchronous>, transform_indices = @transform_15, window_bounds = array<i64: 1, 32>}, {pipeline_mode = #tpu.pipeline_mode<synchronous>, transform_indices = @transform_16, window_bounds = array<i64: 1, 32>}, {pipeline_mode = #tpu.pipeline_mode<synchronous>, transform_indices = @transform_17, window_bounds = array<i64: 1, 32>}, {pipeline_mode = #tpu.pipeline_mode<synchronous>, transform_indices = @transform_18, window_bounds = array<i64: 1, 32>}, {transform_indices = @transform_19, window_bounds = array<i64: 1, 8, 32>}]} {
    %c0_i32 = arith.constant 0 : i32
    %0 = arith.cmpi eq, %arg1, %c0_i32 : i32
    %1 = arith.extui %0 : i1 to i32
    %c0_i32_0 = arith.constant 0 : i32
    %2 = arith.cmpi ne, %1, %c0_i32_0 : i32
    scf.if %2 {
      %c0_56 = arith.constant 0 : index
      %c0_57 = arith.constant 0 : index
      %c0_58 = arith.constant 0 : index
      %108 = vector.load %arg3[%c0_56, %c0_57, %c0_58] : memref<1x8x32xbf16, #tpu.memory_space<vmem>>, vector<1x8x32xbf16>
      %109 = vector.shape_cast %108 : vector<1x8x32xbf16> to vector<8x32xbf16>
      %c0_59 = arith.constant 0 : index
      %c0_60 = arith.constant 0 : index
      %110 = vector.load %arg6[%c0_59, %c0_60] : memref<32x32xbf16, #tpu.memory_space<vmem>>, vector<32x32xbf16>
      %cst_61 = arith.constant dense<0.000000e+00> : vector<8x32xf32>
      %111 = tpu.matmul %109, %110, %cst_61 {dimension_numbers = #tpu.dot_dimension_numbers<[1], [0], [0], [1], [0, 0, 1, 1], [], []>} : vector<8x32xbf16>, vector<32x32xbf16>, vector<8x32xf32> -> vector<8x32xf32>
      %c0_62 = arith.constant 0 : index
      %c0_63 = arith.constant 0 : index
      %112 = vector.load %arg9[%c0_62, %c0_63] : memref<1x32xf32, #tpu.memory_space<vmem>>, vector<1x32xf32>
      %113 = vector.broadcast %112 : vector<1x32xf32> to vector<8x32xf32>
      %114 = arith.addf %111, %113 : vector<8x32xf32>
      %c0_64 = arith.constant 0 : index
      %c0_65 = arith.constant 0 : index
      %c0_66 = arith.constant 0 : index
      %115 = vector.load %arg4[%c0_64, %c0_65, %c0_66] : memref<1x8x32xbf16, #tpu.memory_space<vmem>>, vector<1x8x32xbf16>
      %116 = vector.shape_cast %115 : vector<1x8x32xbf16> to vector<8x32xbf16>
      %c0_67 = arith.constant 0 : index
      %c0_68 = arith.constant 0 : index
      %117 = vector.load %arg7[%c0_67, %c0_68] : memref<32x32xbf16, #tpu.memory_space<vmem>>, vector<32x32xbf16>
      %cst_69 = arith.constant dense<0.000000e+00> : vector<8x32xf32>
      %118 = tpu.matmul %116, %117, %cst_69 {dimension_numbers = #tpu.dot_dimension_numbers<[1], [0], [0], [1], [0, 0, 1, 1], [], []>} : vector<8x32xbf16>, vector<32x32xbf16>, vector<8x32xf32> -> vector<8x32xf32>
      %c0_70 = arith.constant 0 : index
      %c0_71 = arith.constant 0 : index
      %119 = vector.load %arg10[%c0_70, %c0_71] : memref<1x32xf32, #tpu.memory_space<vmem>>, vector<1x32xf32>
      %120 = vector.broadcast %119 : vector<1x32xf32> to vector<8x32xf32>
      %121 = arith.addf %118, %120 : vector<8x32xf32>
      %122 = arith.truncf %114 : vector<8x32xf32> to vector<8x32xbf16>
      %123 = vector.shape_cast %122 : vector<8x32xbf16> to vector<8x4x8xbf16>
      %124 = tpu.transpose %123, [1, 0, 2] : vector<8x4x8xbf16> -> vector<4x8x8xbf16>
      %c0_72 = arith.constant 0 : index
      %c0_73 = arith.constant 0 : index
      %c0_74 = arith.constant 0 : index
      %125 = vector.load %arg22[%c0_72, %c0_73, %c0_74] : memref<4x8x8xbf16, #tpu.memory_space<vmem>>, vector<4x8x8xbf16>
      tpu.vector_store %arg22[%c0_72, %c0_73, %c0_74], %124 {strides = array<i32>} : memref<4x8x8xbf16, #tpu.memory_space<vmem>>, vector<4x8x8xbf16>,
      %126 = arith.truncf %121 : vector<8x32xf32> to vector<8x32xbf16>
      %127 = vector.shape_cast %126 : vector<8x32xbf16> to vector<8x4x8xbf16>
      %128 = tpu.transpose %127, [1, 0, 2] : vector<8x4x8xbf16> -> vector<4x8x8xbf16>
      %c0_75 = arith.constant 0 : index
      %c0_76 = arith.constant 0 : index
      %c0_77 = arith.constant 0 : index
      %129 = vector.load %arg23[%c0_75, %c0_76, %c0_77] : memref<4x8x8xbf16, #tpu.memory_space<vmem>>, vector<4x8x8xbf16>
      tpu.vector_store %arg23[%c0_75, %c0_76, %c0_77], %128 {strides = array<i32>} : memref<4x8x8xbf16, #tpu.memory_space<vmem>>, vector<4x8x8xbf16>,
    } else {
    }
    %c8_i32 = arith.constant 8 : i32
    %3 = arith.muli %arg1, %c8_i32 : i32
    %4 = tpu.assume_multiple %3, 8 : i32
    %c0 = arith.constant 0 : index
    %5 = arith.index_cast %4 : i32 to index
    %c0_1 = arith.constant 0 : index
    %6 = vector.load %arg3[%c0, %5, %c0_1] : memref<1x8x32xbf16, #tpu.memory_space<vmem>>, vector<1x8x32xbf16>
    %7 = vector.shape_cast %6 : vector<1x8x32xbf16> to vector<8x32xbf16>
    %c0_2 = arith.constant 0 : index
    %c0_3 = arith.constant 0 : index
    %8 = vector.load %arg5[%c0_2, %c0_3] : memref<32x32xbf16, #tpu.memory_space<vmem>>, vector<32x32xbf16>
    %cst = arith.constant dense<0.000000e+00> : vector<8x32xf32>
    %9 = tpu.matmul %7, %8, %cst {dimension_numbers = #tpu.dot_dimension_numbers<[1], [0], [0], [1], [0, 0, 1, 1], [], []>} : vector<8x32xbf16>, vector<32x32xbf16>, vector<8x32xf32> -> vector<8x32xf32>
    %c0_4 = arith.constant 0 : index
    %c0_5 = arith.constant 0 : index
    %10 = vector.load %arg8[%c0_4, %c0_5] : memref<1x32xf32, #tpu.memory_space<vmem>>, vector<1x32xf32>
    %11 = vector.broadcast %10 : vector<1x32xf32> to vector<8x32xf32>
    %12 = arith.addf %9, %11 : vector<8x32xf32>
    %13 = arith.truncf %12 : vector<8x32xf32> to vector<8x32xbf16>
    %14 = vector.shape_cast %13 : vector<8x32xbf16> to vector<8x4x8xbf16>
    %15 = tpu.transpose %14, [1, 0, 2] : vector<8x4x8xbf16> -> vector<4x8x8xbf16>
    %c0_6 = arith.constant 0 : index
    %c0_7 = arith.constant 0 : index
    %c0_8 = arith.constant 0 : index
    %16 = vector.load %arg22[%c0_6, %c0_7, %c0_8] : memref<4x8x8xbf16, #tpu.memory_space<vmem>>, vector<4x8x8xbf16>
    "tpu.trace_start"() <{level = 10 : i32, message = "hqe,hke->hqk"}> : () -> ()
    %cst_9 = arith.constant dense<0.000000e+00> : vector<4x8x8xf32>
    %17 = tpu.matmul %15, %16, %cst_9 {dimension_numbers = #tpu.dot_dimension_numbers<[2], [2], [1], [1], [0, 0, 0, 1, 1, 1], [0], [0]>} : vector<4x8x8xbf16>, vector<4x8x8xbf16>, vector<4x8x8xf32> -> vector<4x8x8xf32>
    "tpu.trace_stop"() : () -> ()
    %cst_10 = arith.constant dense<0xFF800000> : vector<4x8xf32>
    %18 = vector.multi_reduction <maximumf>, %17, %cst_10 [2] : vector<4x8x8xf32> to vector<4x8xf32>
    %19 = vector.shape_cast %18 : vector<4x8xf32> to vector<4x8x1xf32>
    %20 = vector.broadcast %19 : vector<4x8x1xf32> to vector<4x8x8xf32>
    %21 = arith.subf %17, %20 : vector<4x8x8xf32>
    %22 = math.exp %21 : vector<4x8x8xf32>
    %cst_11 = arith.constant dense<0.000000e+00> : vector<4x8xf32>
    %23 = vector.multi_reduction <add>, %22, %cst_11 [2] : vector<4x8x8xf32> to vector<4x8xf32>
    %24 = vector.shape_cast %23 : vector<4x8xf32> to vector<4x8x1xf32>
    %25 = tpu.reciprocal %24 {approx = true} : vector<4x8x1xf32> -> vector<4x8x1xf32>
    %26 = vector.broadcast %25 : vector<4x8x1xf32> to vector<4x8x8xf32>
    %27 = arith.mulf %22, %26 : vector<4x8x8xf32>
    %28 = arith.truncf %27 : vector<4x8x8xf32> to vector<4x8x8xbf16>
    %c0_12 = arith.constant 0 : index
    %c0_13 = arith.constant 0 : index
    %c0_14 = arith.constant 0 : index
    %29 = vector.load %arg23[%c0_12, %c0_13, %c0_14] : memref<4x8x8xbf16, #tpu.memory_space<vmem>>, vector<4x8x8xbf16>
    "tpu.trace_start"() <{level = 10 : i32, message = "hqk,hke->hqe"}> : () -> ()
    %cst_15 = arith.constant dense<0.000000e+00> : vector<4x8x8xf32>
    %30 = tpu.matmul %28, %29, %cst_15 {dimension_numbers = #tpu.dot_dimension_numbers<[2], [1], [1], [2], [0, 0, 0, 1, 1, 2], [0], [0]>} : vector<4x8x8xbf16>, vector<4x8x8xbf16>, vector<4x8x8xf32> -> vector<4x8x8xf32>
    "tpu.trace_stop"() : () -> ()
    %31 = arith.truncf %30 : vector<4x8x8xf32> to vector<4x8x8xbf16>
    %32 = tpu.transpose %31, [1, 0, 2] : vector<4x8x8xbf16> -> vector<8x4x8xbf16>
    %33 = vector.shape_cast %32 : vector<8x4x8xbf16> to vector<8x32xbf16>
    %c0_16 = arith.constant 0 : index
    %c0_17 = arith.constant 0 : index
    %34 = vector.load %arg11[%c0_16, %c0_17] : memref<32x32xbf16, #tpu.memory_space<vmem>>, vector<32x32xbf16>
    %cst_18 = arith.constant dense<0.000000e+00> : vector<8x32xf32>
    %35 = tpu.matmul %33, %34, %cst_18 {dimension_numbers = #tpu.dot_dimension_numbers<[1], [0], [0], [1], [0, 0, 1, 1], [], []>} : vector<8x32xbf16>, vector<32x32xbf16>, vector<8x32xf32> -> vector<8x32xf32>
    %c0_19 = arith.constant 0 : index
    %c0_20 = arith.constant 0 : index
    %36 = vector.load %arg12[%c0_19, %c0_20] : memref<1x32xf32, #tpu.memory_space<vmem>>, vector<1x32xf32>
    %37 = vector.broadcast %36 : vector<1x32xf32> to vector<8x32xf32>
    %38 = arith.addf %35, %37 : vector<8x32xf32>
    %c0_21 = arith.constant 0 : index
    %c0_22 = arith.constant 0 : index
    %c0_23 = arith.constant 0 : index
    %39 = vector.load %arg2[%c0_21, %c0_22, %c0_23] : memref<1x8x32xf32, #tpu.memory_space<vmem>>, vector<1x8x32xf32>
    %40 = vector.shape_cast %39 : vector<1x8x32xf32> to vector<8x32xf32>
    %41 = arith.addf %40, %38 : vector<8x32xf32>
    %cst_24 = arith.constant dense<0.000000e+00> : vector<8xf32>
    %42 = vector.multi_reduction <add>, %41, %cst_24 [1] : vector<8x32xf32> to vector<8xf32>
    %43 = vector.shape_cast %42 : vector<8xf32> to vector<8x1xf32>
    %cst_25 = arith.constant 3.200000e+01 : f32
    %44 = vector.broadcast %cst_25 : f32 to vector<8x1xf32>
    %45 = arith.divf %43, %44 : vector<8x1xf32>
    %46 = vector.broadcast %45 : vector<8x1xf32> to vector<8x32xf32>
    %47 = arith.subf %41, %46 : vector<8x32xf32>
    %48 = arith.mulf %47, %47 : vector<8x32xf32>
    %cst_26 = arith.constant dense<0.000000e+00> : vector<8xf32>
    %49 = vector.multi_reduction <add>, %48, %cst_26 [1] : vector<8x32xf32> to vector<8xf32>
    %50 = vector.shape_cast %49 : vector<8xf32> to vector<8x1xf32>
    %cst_27 = arith.constant 3.200000e+01 : f32
    %51 = vector.broadcast %cst_27 : f32 to vector<8x1xf32>
    %52 = arith.divf %50, %51 : vector<8x1xf32>
    %53 = vector.broadcast %45 : vector<8x1xf32> to vector<8x32xf32>
    %54 = arith.subf %41, %53 : vector<8x32xf32>
    %cst_28 = arith.constant 9.99999974E-6 : f32
    %55 = vector.broadcast %cst_28 : f32 to vector<8x1xf32>
    %56 = arith.addf %52, %55 : vector<8x1xf32>
    %57 = math.rsqrt %56 : vector<8x1xf32>
    %58 = vector.broadcast %57 : vector<8x1xf32> to vector<8x32xf32>
    %59 = arith.mulf %54, %58 : vector<8x32xf32>
    %c0_29 = arith.constant 0 : index
    %c0_30 = arith.constant 0 : index
    %60 = vector.load %arg17[%c0_29, %c0_30] : memref<1x32xf32, #tpu.memory_space<vmem>>, vector<1x32xf32>
    %61 = vector.broadcast %60 : vector<1x32xf32> to vector<8x32xf32>
    %62 = arith.mulf %59, %61 : vector<8x32xf32>
    %c0_31 = arith.constant 0 : index
    %c0_32 = arith.constant 0 : index
    %63 = vector.load %arg18[%c0_31, %c0_32] : memref<1x32xf32, #tpu.memory_space<vmem>>, vector<1x32xf32>
    %64 = vector.broadcast %63 : vector<1x32xf32> to vector<8x32xf32>
    %65 = arith.addf %62, %64 : vector<8x32xf32>
    %66 = arith.truncf %65 : vector<8x32xf32> to vector<8x32xbf16>
    %c0_33 = arith.constant 0 : index
    %c0_34 = arith.constant 0 : index
    %67 = vector.load %arg13[%c0_33, %c0_34] : memref<32x64xbf16, #tpu.memory_space<vmem>>, vector<32x64xbf16>
    %cst_35 = arith.constant dense<0.000000e+00> : vector<8x64xf32>
    %68 = tpu.matmul %66, %67, %cst_35 {dimension_numbers = #tpu.dot_dimension_numbers<[1], [0], [0], [1], [0, 0, 1, 1], [], []>} : vector<8x32xbf16>, vector<32x64xbf16>, vector<8x64xf32> -> vector<8x64xf32>
    %c0_36 = arith.constant 0 : index
    %c0_37 = arith.constant 0 : index
    %69 = vector.load %arg14[%c0_36, %c0_37] : memref<1x64xf32, #tpu.memory_space<vmem>>, vector<1x64xf32>
    %70 = vector.broadcast %69 : vector<1x64xf32> to vector<8x64xf32>
    %71 = arith.addf %68, %70 : vector<8x64xf32>
    %cst_38 = arith.constant 0.000000e+00 : f32
    %72 = vector.broadcast %cst_38 : f32 to vector<8x64xf32>
    %73 = arith.maximumf %71, %72 : vector<8x64xf32>
    %74 = arith.truncf %73 : vector<8x64xf32> to vector<8x64xbf16>
    %c0_39 = arith.constant 0 : index
    %c0_40 = arith.constant 0 : index
    %75 = vector.load %arg15[%c0_39, %c0_40] : memref<64x32xbf16, #tpu.memory_space<vmem>>, vector<64x32xbf16>
    %cst_41 = arith.constant dense<0.000000e+00> : vector<8x32xf32>
    %76 = tpu.matmul %74, %75, %cst_41 {dimension_numbers = #tpu.dot_dimension_numbers<[1], [0], [0], [1], [0, 0, 1, 1], [], []>} : vector<8x64xbf16>, vector<64x32xbf16>, vector<8x32xf32> -> vector<8x32xf32>
    %c0_42 = arith.constant 0 : index
    %c0_43 = arith.constant 0 : index
    %77 = vector.load %arg16[%c0_42, %c0_43] : memref<1x32xf32, #tpu.memory_space<vmem>>, vector<1x32xf32>
    %78 = vector.broadcast %77 : vector<1x32xf32> to vector<8x32xf32>
    %79 = arith.addf %76, %78 : vector<8x32xf32>
    %80 = arith.addf %65, %79 : vector<8x32xf32>
    %cst_44 = arith.constant dense<0.000000e+00> : vector<8xf32>
    %81 = vector.multi_reduction <add>, %80, %cst_44 [1] : vector<8x32xf32> to vector<8xf32>
    %82 = vector.shape_cast %81 : vector<8xf32> to vector<8x1xf32>
    %cst_45 = arith.constant 3.200000e+01 : f32
    %83 = vector.broadcast %cst_45 : f32 to vector<8x1xf32>
    %84 = arith.divf %82, %83 : vector<8x1xf32>
    %85 = vector.broadcast %84 : vector<8x1xf32> to vector<8x32xf32>
    %86 = arith.subf %80, %85 : vector<8x32xf32>
    %87 = arith.mulf %86, %86 : vector<8x32xf32>
    %cst_46 = arith.constant dense<0.000000e+00> : vector<8xf32>
    %88 = vector.multi_reduction <add>, %87, %cst_46 [1] : vector<8x32xf32> to vector<8xf32>
    %89 = vector.shape_cast %88 : vector<8xf32> to vector<8x1xf32>
    %cst_47 = arith.constant 3.200000e+01 : f32
    %90 = vector.broadcast %cst_47 : f32 to vector<8x1xf32>
    %91 = arith.divf %89, %90 : vector<8x1xf32>
    %92 = vector.broadcast %84 : vector<8x1xf32> to vector<8x32xf32>
    %93 = arith.subf %80, %92 : vector<8x32xf32>
    %cst_48 = arith.constant 9.99999974E-6 : f32
    %94 = vector.broadcast %cst_48 : f32 to vector<8x1xf32>
    %95 = arith.addf %91, %94 : vector<8x1xf32>
    %96 = math.rsqrt %95 : vector<8x1xf32>
    %97 = vector.broadcast %96 : vector<8x1xf32> to vector<8x32xf32>
    %98 = arith.mulf %93, %97 : vector<8x32xf32>
    %c0_49 = arith.constant 0 : index
    %c0_50 = arith.constant 0 : index
    %99 = vector.load %arg19[%c0_49, %c0_50] : memref<1x32xf32, #tpu.memory_space<vmem>>, vector<1x32xf32>
    %100 = vector.broadcast %99 : vector<1x32xf32> to vector<8x32xf32>
    %101 = arith.mulf %98, %100 : vector<8x32xf32>
    %c0_51 = arith.constant 0 : index
    %c0_52 = arith.constant 0 : index
    %102 = vector.load %arg20[%c0_51, %c0_52] : memref<1x32xf32, #tpu.memory_space<vmem>>, vector<1x32xf32>
    %103 = vector.broadcast %102 : vector<1x32xf32> to vector<8x32xf32>
    %104 = arith.addf %101, %103 : vector<8x32xf32>
    %c0_53 = arith.constant 0 : index
    %c0_54 = arith.constant 0 : index
    %c0_55 = arith.constant 0 : index
    %105 = vector.load %arg21[%c0_53, %c0_54, %c0_55] : memref<1x8x32xf32, #tpu.memory_space<vmem>>, vector<1x8x32xf32>
    %106 = vector.shape_cast %105 : vector<1x8x32xf32> to vector<8x32xf32>
    %107 = vector.shape_cast %104 : vector<8x32xf32> to vector<1x8x32xf32>
    tpu.vector_store %arg21[%c0_53, %c0_54, %c0_55], %107 {strides = array<i32>} : memref<1x8x32xf32, #tpu.memory_space<vmem>>, vector<1x8x32xf32>,
    return
  }
  func.func @transform_0(%arg0: i32, %arg1: i32) -> (i32, i32, i32) {
    %c0_i32 = arith.constant 0 : i32
    %c0_i32_0 = arith.constant 0 : i32
    return %arg0, %arg1, %c0_i32 : i32, i32, i32
  }
  func.func @transform_1(%arg0: i32, %arg1: i32) -> (i32, i32, i32) {
    %c0_i32 = arith.constant 0 : i32
    %c0_i32_0 = arith.constant 0 : i32
    %c0_i32_1 = arith.constant 0 : i32
    return %arg0, %c0_i32, %c0_i32_0 : i32, i32, i32
  }
  func.func @transform_2(%arg0: i32, %arg1: i32) -> (i32, i32, i32) {
    %c0_i32 = arith.constant 0 : i32
    %c0_i32_0 = arith.constant 0 : i32
    %c0_i32_1 = arith.constant 0 : i32
    return %arg0, %c0_i32, %c0_i32_0 : i32, i32, i32
  }
  func.func @transform_3(%arg0: i32, %arg1: i32) -> (i32, i32) {
    %c0_i32 = arith.constant 0 : i32
    %c0_i32_0 = arith.constant 0 : i32
    %c0_i32_1 = arith.constant 0 : i32
    return %c0_i32, %c0_i32_0 : i32, i32
  }
  func.func @transform_4(%arg0: i32, %arg1: i32) -> (i32, i32) {
    %c0_i32 = arith.constant 0 : i32
    %c0_i32_0 = arith.constant 0 : i32
    %c0_i32_1 = arith.constant 0 : i32
    return %c0_i32, %c0_i32_0 : i32, i32
  }
  func.func @transform_5(%arg0: i32, %arg1: i32) -> (i32, i32) {
    %c0_i32 = arith.constant 0 : i32
    %c0_i32_0 = arith.constant 0 : i32
    %c0_i32_1 = arith.constant 0 : i32
    return %c0_i32, %c0_i32_0 : i32, i32
  }
  func.func @transform_6(%arg0: i32, %arg1: i32) -> (i32, i32) {
    %c0_i32 = arith.constant 0 : i32
    %c0_i32_0 = arith.constant 0 : i32
    %c0_i32_1 = arith.constant 0 : i32
    return %c0_i32, %c0_i32_0 : i32, i32
  }
  func.func @transform_7(%arg0: i32, %arg1: i32) -> (i32, i32) {
    %c0_i32 = arith.constant 0 : i32
    %c0_i32_0 = arith.constant 0 : i32
    %c0_i32_1 = arith.constant 0 : i32
    return %c0_i32, %c0_i32_0 : i32, i32
  }
  func.func @transform_8(%arg0: i32, %arg1: i32) -> (i32, i32) {
    %c0_i32 = arith.constant 0 : i32
    %c0_i32_0 = arith.constant 0 : i32
    %c0_i32_1 = arith.constant 0 : i32
    return %c0_i32, %c0_i32_0 : i32, i32
  }
  func.func @transform_9(%arg0: i32, %arg1: i32) -> (i32, i32) {
    %c0_i32 = arith.constant 0 : i32
    %c0_i32_0 = arith.constant 0 : i32
    %c0_i32_1 = arith.constant 0 : i32
    return %c0_i32, %c0_i32_0 : i32, i32
  }
  func.func @transform_10(%arg0: i32, %arg1: i32) -> (i32, i32) {
    %c0_i32 = arith.constant 0 : i32
    %c0_i32_0 = arith.constant 0 : i32
    %c0_i32_1 = arith.constant 0 : i32
    return %c0_i32, %c0_i32_0 : i32, i32
  }
  func.func @transform_11(%arg0: i32, %arg1: i32) -> (i32, i32) {
    %c0_i32 = arith.constant 0 : i32
    %c0_i32_0 = arith.constant 0 : i32
    %c0_i32_1 = arith.constant 0 : i32
    return %c0_i32, %c0_i32_0 : i32, i32
  }
  func.func @transform_12(%arg0: i32, %arg1: i32) -> (i32, i32) {
    %c0_i32 = arith.constant 0 : i32
    %c0_i32_0 = arith.constant 0 : i32
    %c0_i32_1 = arith.constant 0 : i32
    return %c0_i32, %c0_i32_0 : i32, i32
  }
  func.func @transform_13(%arg0: i32, %arg1: i32) -> (i32, i32) {
    %c0_i32 = arith.constant 0 : i32
    %c0_i32_0 = arith.constant 0 : i32
    %c0_i32_1 = arith.constant 0 : i32
    return %c0_i32, %c0_i32_0 : i32, i32
  }
  func.func @transform_14(%arg0: i32, %arg1: i32) -> (i32, i32) {
    %c0_i32 = arith.constant 0 : i32
    %c0_i32_0 = arith.constant 0 : i32
    %c0_i32_1 = arith.constant 0 : i32
    return %c0_i32, %c0_i32_0 : i32, i32
  }
  func.func @transform_15(%arg0: i32, %arg1: i32) -> (i32, i32) {
    %c0_i32 = arith.constant 0 : i32
    %c0_i32_0 = arith.constant 0 : i32
    %c0_i32_1 = arith.constant 0 : i32
    return %c0_i32, %c0_i32_0 : i32, i32
  }
  func.func @transform_16(%arg0: i32, %arg1: i32) -> (i32, i32) {
    %c0_i32 = arith.constant 0 : i32
    %c0_i32_0 = arith.constant 0 : i32
    %c0_i32_1 = arith.constant 0 : i32
    return %c0_i32, %c0_i32_0 : i32, i32
  }
  func.func @transform_17(%arg0: i32, %arg1: i32) -> (i32, i32) {
    %c0_i32 = arith.constant 0 : i32
    %c0_i32_0 = arith.constant 0 : i32
    %c0_i32_1 = arith.constant 0 : i32
    return %c0_i32, %c0_i32_0 : i32, i32
  }
  func.func @transform_18(%arg0: i32, %arg1: i32) -> (i32, i32) {
    %c0_i32 = arith.constant 0 : i32
    %c0_i32_0 = arith.constant 0 : i32
    %c0_i32_1 = arith.constant 0 : i32
    return %c0_i32, %c0_i32_0 : i32, i32
  }
  func.func @transform_19(%arg0: i32, %arg1: i32) -> (i32, i32, i32) {
    %c0_i32 = arith.constant 0 : i32
    %c0_i32_0 = arith.constant 0 : i32
    return %arg0, %arg1, %c0_i32 : i32, i32, i32
  }
}

</mosaic_0001>

<bundles_post_ra>
// kernel: tpu_custom_call.1
= control target key start
LH: loop header
LB: loop body
LE: loop exit
PB: predicated region body
PF: predicated region fallthrough
CT: control target
= control target key end

     0   :  { %s4974_s0 = inlined_call_operand.hbm [shape: f32[2,8,32], index: 0, kind: input, shape index: {}]   ;;  %s4975_s1 = inlined_call_operand.hbm [shape: bf16[2,8,32], index: 1, kind: input, shape index: {}]   ;;  %s4976_s2 = inlined_call_operand.hbm [shape: bf16[2,8,32], index: 2, kind: input, shape index: {}]   ;;  %s4977_s3 = inlined_call_operand.hbm [shape: bf16[32,32], index: 3, kind: input, shape index: {}]   ;;  %s4978_s4 = inlined_call_operand.hbm [shape: bf16[32,32], index: 4, kind: input, shape index: {}]   ;;  %s4979_s5 = inlined_call_operand.hbm [shape: bf16[32,32], index: 5, kind: input, shape index: {}]   ;;  %s4980_s6 = inlined_call_operand.hbm [shape: f32[1,32], index: 6, kind: input, shape index: {}]   ;;  %s4981_s7 = inlined_call_operand.hbm [shape: f32[1,32], index: 7, kind: input, shape index: {}]   ;;  %s4982_s8 = inlined_call_operand.hbm [shape: f32[1,32], index: 8, kind: input, shape index: {}]   ;;  %s4983_s9 = inlined_call_operand.hbm [shape: bf16[32,32], index: 9, kind: input, shape index: {}]   ;;  %s4984_s10 = inlined_call_operand.hbm [shape: f32[1,32], index: 10, kind: input, shape index: {}]   ;;  %s4985_s11 = inlined_call_operand.hbm [shape: bf16[32,64], index: 11, kind: input, shape index: {}]   ;;  %s4986_s12 = inlined_call_operand.hbm [shape: f32[1,64], index: 12, kind: input, shape index: {}]   ;;  %s4987_s13 = inlined_call_operand.hbm [shape: bf16[64,32], index: 13, kind: input, shape index: {}]   ;;  %s4988_s14 = inlined_call_operand.hbm [shape: f32[1,32], index: 14, kind: input, shape index: {}]   ;;  %s4989_s15 = inlined_call_operand.hbm [shape: f32[1,32], index: 15, kind: input, shape index: {}]   ;;  %s4990_s16 = inlined_call_operand.hbm [shape: f32[1,32], index: 16, kind: input, shape index: {}]   ;;  %s4991_s17 = inlined_call_operand.hbm [shape: f32[1,32], index: 17, kind: input, shape index: {}]   ;;  %s4992_s18 = inlined_call_operand.hbm [shape: f32[1,32], index: 18, kind: input, shape index: {}]   ;;  %s4993_s19 = inlined_call_operand.hbm [shape: f32[2,8,32], index: 19, kind: output, shape index: {}]  }
   0x1   :  { %5033 = sst [smem:[#allocation52_spill]] %s4974_s0 }
   0x2   :  { %5034 = sst [smem:[#allocation53_spill]] %s4975_s1 }
   0x3   :  { %5035 = sst [smem:[#allocation54_spill]] %s4976_s2 }
   0x4   :  { %5036 = sst [smem:[#allocation55_spill]] %s4977_s3 }
   0x5   :  { %5037 = sst [smem:[#allocation56_spill]] %s4978_s4 }
   0x6   :  { %5038 = sst [smem:[#allocation57_spill]] %s4979_s5 }
   0x7   :  { %5039 = sst [smem:[#allocation58_spill]] %s4980_s6 }
   0x8   :  { %5040 = sst [smem:[#allocation59_spill]] %s4981_s7 }
   0x9   :  { %5041 = sst [smem:[#allocation60_spill]] %s4982_s8 }
   0xa   :  { %5042 = sst [smem:[#allocation61_spill]] %s4983_s9 }
   0xb   :  { %5043 = sst [smem:[#allocation62_spill]] %s4984_s10 }
   0xc   :  { %5044 = sst [smem:[#allocation63_spill]] %s4985_s11 }
   0xd   :  { %5045 = sst [smem:[#allocation64_spill]] %s4986_s12 }
   0xe   :  { %5046 = sst [smem:[#allocation65_spill]] %s4987_s13 }
   0xf   :  { %5047 = sst [smem:[#allocation66_spill]] %s4988_s14 }
  0x10   :  { %5048 = sst [smem:[#allocation67_spill]] %s4989_s15 }
  0x11   :  { %5049 = sst [smem:[#allocation68_spill]] %s4990_s16 }
  0x12   :  { %5050 = sst [smem:[#allocation69_spill]] %s4991_s17 }
  0x13   :  { %5051 = sst [smem:[#allocation70_spill]] %s4992_s18 }
  0x14   :  { %5052 = sst [smem:[#allocation71_spill]] %s4993_s19 }
  0x15   :  { %24 = vsyncpa [#allocation5], 0 }
  0x16   :  { %26 = vsyncpa [#allocation5 + $0x1], 0 }
  0x17   :  { %27 = vsyncpa [#allocation8], 0 }
  0x18   :  { %29 = vsyncpa [#allocation8 + $0x1], 0 }
  0x19   :  { %30 = vsyncpa [#allocation11], 0 }
  0x1a   :  { %31 = vsyncpa [#allocation14], 0 }
  0x1b   :  { %32 = vsyncpa [#allocation17], 0 }
  0x1c   :  { %33 = vsyncpa [#allocation20], 0 }
  0x1d   :  { %34 = vsyncpa [#allocation23], 0 }
  0x1e   :  { %35 = vsyncpa [#allocation26], 0 }
  0x1f   :  { %36 = vsyncpa [#allocation29], 0 }
  0x20   :  { %37 = vsyncpa [#allocation32], 0 }
  0x21   :  { %38 = vsyncpa [#allocation6], 0 }
  0x22   :  { %40 = vsyncpa [#allocation6 + $0x1], 0  ;;  %s4126_s0 = smov 0   ;;  %s4128_s30 = smov 0  }
  0x23   :  { %s4130_s20 = smov 0   ;;  %s4132_s21 = smov 0  }
  0x24   :  { %s4134_s1 = smov 0   ;;  %s4136_s22 = smov 0  }
  0x25 LB: > { %5053 = sst [smem:[#allocation46_spill]] %s3979_s20  ;;  %s4157_s2 = sadd.s32 4294967295, %s3991_s22   ;;  %s3991_s22 = sphi %s4136_s22, %s46_s22   ;;  %s3987_s1 = sphi %s4134_s1, %s5129_s1   ;;  %s3983_s21 = sphi %s4132_s21, %s5128_s21   ;;  %s3979_s20 = sphi %s4130_s20, %s5124_s20   ;;  %s3975_s30 = sphi %s4128_s30, %s5127_s30   ;;  %s3971_s0 = sphi %s4126_s0, %s5126_s0  }
  0x26   : > { %5054 = sst [smem:[#allocation47_spill]] %s3983_s21  ;;  %p2832_p0 = scmp.ge.s32.totalorder %s3991_s22, 1 }
  0x27   : > { %5055 = sst [smem:[#allocation48_spill]] %s3991_s22  ;;  %p5007_p1 = scmp.eq.s32.totalorder %s4157_s2, 0 }
  0x28   : > { %p507_p2 = scmp.lt.s32.totalorder %s3991_s22, 3  ;;  %s3993_s24 = smov [#allocation10]  }
  0x29   : > { %s519_s25 = sshll.u32 %s3993_s24, 4  ;;  %s3994_s26 = smov [#allocation13]   ;;  %s4166_s25 = int_to_ptr.vmem [resolvable:$true] %s519_s25 }
  0x2a   : > { %p4162_p3 = pnand %p2832_p0, %p507_p2  ;;  %s545_s27 = sshll.u32 %s3994_s26, 4  ;;  %s4177_s27 = int_to_ptr.vmem [resolvable:$true] %s545_s27 }
  0x2b   : > { %s3995_s28 = smov [#allocation16]   ;;  %s5059_s21 = sld [smem:[#allocation55_spill]] }
  0x2c   : > { %s5056_s23 = scalar_select %p4162_p3, 1, 0 }
  0x2d   : > { %p3127_p4 = pneg %p4162_p3  ;;  %s4179_s29 = sshll.u32 %s3995_s28, 4  ;;  %s571_s29 = int_to_ptr.vmem [resolvable:$true] %s4179_s29 }
  0x2e   : > { %5057 = sst [smem:[#allocation49_spill]] %s5056_s23 }
  0x2f   : > { %p4173_p6 = pnand %p3127_p4, %p5007_p1 }
  0x31   : > { %s5058_s3 = scalar_select %p4173_p6, 1, 0 }
  0x32   : > { %s5060_s18 = smov %s5059_s21  ;;  %s3335_s16 = scalar_lea.hbm %s5059_s21, 256 }
  0x33   : > { %p3336_p7 = scmp.ne.s32.totalorder %s5060_s18, %s3335_s16  ;;  %p4189_p8 = pneg %p4173_p6 }
  0x34   : > { %p3342_p11 = scmp.lt.u32.totalorder %s3335_s16, %s5060_s18 }
  0x35   : > { %s5061_s12 = scalar_select %p4189_p8, 1, 0 }
  0x36   : > { %p3338_p9 = pnand %p4189_p8, %p3336_p7 }
  0x38   : > { %p3339_p10 = pneg %p3338_p9 }
  0x3a   : > { %p3344_p12 = pnand %p3342_p11, %p3339_p10 }
  0x3c   : > { %3347 = shalt.err (!%p3344_p12)
}
  0x3d   : > { %s3348_s14 = scalar_lea.vmem %s4166_s25, 256  ;;  %p3356_p4 = scmp.lt.s32.totalorder %s4166_s25, %s4166_s25 }
  0x3e   : > { %p3349_p13 = scmp.ne.s32.totalorder %s4166_s25, %s3348_s14  ;;  %p3357_p5 = scmp.lt.s32.totalorder %s3348_s14, %s3348_s14 }
  0x40   : > { %p3351_p0 = pnand %p3349_p13, %p4189_p8  ;;  %p3358_p7 = por %p3357_p5, %p3356_p4 }
  0x42   : > { %p3352_p2 = pneg %p3351_p0 }
  0x44   : > { %p3359_p9 = pnand %p3358_p7, %p3352_p2 }
  0x46   : > { %3362 = shalt.err (!%p3359_p9)
}
  0x47   : > { %s5009_s19 = smov 64   ;;  %s5011_s16 = smov 4  }
  0x48   : > { %3130 = dma.hbm_to_vmem [thread:$0]  (!%p4173_p6), %s5060_s18, 256, %s4166_s25, [#allocation11], %s5009_s19, %s5009_s19, %s5011_s16  }
  0x49   : > { %s5062_s5 = sld [smem:[#allocation57_spill]] }
  0x4f   : > { %s3363_s28 = scalar_lea.hbm %s5062_s5, 256 }
  0x50   : > { %p3364_p5 = scmp.ne.s32.totalorder %s5062_s5, %s3363_s28  ;;  %p3370_p12 = scmp.lt.u32.totalorder %s3363_s28, %s5062_s5 }
  0x52   : > { %p3366_p10 = pnand %p3364_p5, %p4189_p8 }
  0x54   : > { %p3367_p11 = pneg %p3366_p10 }
  0x56   : > { %p3372_p13 = pnand %p3370_p12, %p3367_p11 }
  0x58   : > { %3375 = shalt.err (!%p3372_p13)
}
  0x59   : > { %s3376_s25 = scalar_lea.vmem %s4177_s27, 256  ;;  %p3384_p7 = scmp.lt.s32.totalorder %s4177_s27, %s4177_s27 }
  0x5a   : > { %p3377_p0 = scmp.ne.s32.totalorder %s4177_s27, %s3376_s25  ;;  %p3385_p9 = scmp.lt.s32.totalorder %s3376_s25, %s3376_s25 }
  0x5c   : > { %p3379_p2 = pnand %p3377_p0, %p4189_p8  ;;  %p3386_p5 = por %p3385_p9, %p3384_p7 }
  0x5e   : > { %p3380_p4 = pneg %p3379_p2 }
  0x60   : > { %p3387_p10 = pnand %p3386_p5, %p3380_p4 }
  0x62   : > { %3390 = shalt.err (!%p3387_p10)
}
  0x63   : > { %3136 = dma.hbm_to_vmem [thread:$0]  (!%p4173_p6), %s5062_s5, 256, %s4177_s27, [#allocation14], %s5009_s19, %s5009_s19, %s5011_s16  }
  0x64   : > { %s5063_s7 = sld [smem:[#allocation59_spill]] }
  0x6a   : > { %s3391_s23 = scalar_lea.hbm %s5063_s7, 16 }
  0x6b   : > { %p3392_p11 = scmp.ne.s32.totalorder %s5063_s7, %s3391_s23  ;;  %p3398_p0 = scmp.lt.u32.totalorder %s3391_s23, %s5063_s7 }
  0x6d   : > { %p3394_p12 = pnand %p3392_p11, %p4189_p8 }
  0x6f   : > { %p3395_p13 = pneg %p3394_p12 }
  0x71   : > { %p3400_p2 = pnand %p3398_p0, %p3395_p13 }
  0x73   : > { %3403 = shalt.err (!%p3400_p2)
}
  0x74   : > { %s3404_s25 = scalar_lea.vmem %s571_s29, 16  ;;  %s3411_s27 = scalar_lea.vmem %s571_s29, 32 }
  0x75   : > { %p3405_p4 = scmp.ne.s32.totalorder %s571_s29, %s3404_s25  ;;  %p3412_p5 = scmp.lt.s32.totalorder %s571_s29, %s571_s29 }
  0x76   : > { %p3413_p10 = scmp.lt.s32.totalorder %s3411_s27, %s3404_s25 }
  0x77   : > { %p3407_p7 = pnand %p3405_p4, %p4189_p8 }
  0x78   : > { %p3414_p1 = por %p3413_p10, %p3412_p5 }
  0x79   : > { %p3408_p9 = pneg %p3407_p7 }
  0x7b   : > { %p3415_p3 = pnand %p3414_p1, %p3408_p9 }
  0x7d   : > { %3418 = shalt.err (!%p3415_p3)
}
  0x7e   : > { %3142 = dma.hbm_to_vmem [thread:$0]  (!%p4173_p6), %s5063_s7, 16, %s571_s29, [#allocation17]  }
  0x7f   : > { %s3998_s10 = smov [#allocation19]   ;;  %s3999_s23 = smov [#allocation22]  }
  0x80   : > { %s591_s21 = sshll.u32 %s3998_s10, 4  ;;  %s615_s24 = sshll.u32 %s3999_s23, 4  ;;  %s592_s21 = int_to_ptr.vmem [resolvable:$true] %s591_s21  ;;  %s616_s24 = int_to_ptr.vmem [resolvable:$true] %s615_s24 }
  0x81   : > { %s5064_s9 = sld [smem:[#allocation61_spill]] }
  0x87   : > { %s3419_s14 = scalar_lea.hbm %s5064_s9, 256 }
  0x88   : > { %p3420_p1 = scmp.ne.s32.totalorder %s5064_s9, %s3419_s14  ;;  %p3426_p12 = scmp.lt.u32.totalorder %s3419_s14, %s5064_s9 }
  0x8a   : > { %p3422_p3 = pnand %p3420_p1, %p4189_p8 }
  0x8c   : > { %p3423_p11 = pneg %p3422_p3 }
  0x8e   : > { %p3428_p13 = pnand %p3426_p12, %p3423_p11 }
  0x90   : > { %3431 = shalt.err (!%p3428_p13)
}
  0x91   : > { %s3432_s29 = scalar_lea.vmem %s592_s21, 256  ;;  %p3440_p7 = scmp.lt.s32.totalorder %s592_s21, %s592_s21 }
  0x92   : > { %p3433_p0 = scmp.ne.s32.totalorder %s592_s21, %s3432_s29  ;;  %p3441_p9 = scmp.lt.s32.totalorder %s3432_s29, %s3432_s29 }
  0x94   : > { %p3435_p2 = pnand %p3433_p0, %p4189_p8  ;;  %p3442_p5 = por %p3441_p9, %p3440_p7 }
  0x96   : > { %p3436_p4 = pneg %p3435_p2 }
  0x98   : > { %p3443_p10 = pnand %p3442_p5, %p3436_p4 }
  0x9a   : > { %3446 = shalt.err (!%p3443_p10)
}
  0x9b   : > { %s5065_s8 = smov 64   ;;  %s5066_s11 = sld [smem:[#allocation63_spill]] }
  0x9c   : > { %3148 = dma.hbm_to_vmem [thread:$0]  (!%p4173_p6), %s5064_s9, 256, %s592_s21, [#allocation20], %s5065_s8, %s5065_s8, %s5011_s16  }
  0xa1   : > { %s3447_s28 = scalar_lea.hbm %s5066_s11, 256 }
  0xa2   : > { %p3448_p1 = scmp.ne.s32.totalorder %s5066_s11, %s3447_s28  ;;  %p3454_p12 = scmp.lt.u32.totalorder %s3447_s28, %s5066_s11 }
  0xa4   : > { %p3450_p3 = pnand %p3448_p1, %p4189_p8 }
  0xa6   : > { %p3451_p11 = pneg %p3450_p3 }
  0xa8   : > { %p3456_p13 = pnand %p3454_p12, %p3451_p11 }
  0xaa   : > { %3459 = shalt.err (!%p3456_p13)
}
  0xab   : > { %s3460_s29 = scalar_lea.vmem %s616_s24, 256  ;;  %p3468_p7 = scmp.lt.s32.totalorder %s616_s24, %s616_s24 }
  0xac   : > { %p3461_p0 = scmp.ne.s32.totalorder %s616_s24, %s3460_s29  ;;  %p3469_p9 = scmp.lt.s32.totalorder %s3460_s29, %s3460_s29 }
  0xae   : > { %p3463_p2 = pnand %p3461_p0, %p4189_p8  ;;  %p3470_p5 = por %p3469_p9, %p3468_p7 }
  0xb0   : > { %p3464_p4 = pneg %p3463_p2 }
  0xb2   : > { %p3471_p10 = pnand %p3470_p5, %p3464_p4 }
  0xb4   : > { %3474 = shalt.err (!%p3471_p10)
}
  0xb5   : > { %3154 = dma.hbm_to_vmem [thread:$0]  (!%p4173_p6), %s5066_s11, 256, %s616_s24, [#allocation23], %s5065_s8, %s5065_s8, %s5011_s16  }
  0xb6   : > { %s4000_s10 = smov [#allocation25]   ;;  %s4001_s26 = smov [#allocation28]  }
  0xb7   : > { %s639_s23 = sshll.u32 %s4000_s10, 4  ;;  %s664_s28 = sshll.u32 %s4001_s26, 4  ;;  %s640_s23 = int_to_ptr.vmem [resolvable:$true] %s639_s23  ;;  %s665_s28 = int_to_ptr.vmem [resolvable:$true] %s664_s28 }
  0xb8   : > { %s5067_s13 = sld [smem:[#allocation65_spill]] }
  0xbe   : > { %s3475_s27 = scalar_lea.hbm %s5067_s13, 512 }
  0xbf   : > { %p3476_p1 = scmp.ne.s32.totalorder %s5067_s13, %s3475_s27  ;;  %p3482_p12 = scmp.lt.u32.totalorder %s3475_s27, %s5067_s13 }
  0xc1   : > { %p3478_p3 = pnand %p3476_p1, %p4189_p8 }
  0xc3   : > { %p3479_p11 = pneg %p3478_p3 }
  0xc5   : > { %p3484_p13 = pnand %p3482_p12, %p3479_p11 }
  0xc7   : > { %3487 = shalt.err (!%p3484_p13)
}
  0xc8   : > { %s3488_s24 = scalar_lea.vmem %s640_s23, 512  ;;  %p3496_p7 = scmp.lt.s32.totalorder %s640_s23, %s640_s23 }
  0xc9   : > { %p3489_p0 = scmp.ne.s32.totalorder %s640_s23, %s3488_s24  ;;  %p3497_p9 = scmp.lt.s32.totalorder %s3488_s24, %s3488_s24 }
  0xcb   : > { %p3491_p2 = pnand %p3489_p0, %p4189_p8  ;;  %p3498_p5 = por %p3497_p9, %p3496_p7 }
  0xcd   : > { %p3492_p4 = pneg %p3491_p2 }
  0xcf   : > { %p3499_p10 = pnand %p3498_p5, %p3492_p4 }
  0xd1   : > { %3502 = shalt.err (!%p3499_p10)
}
  0xd2   : > { %3160 = dma.hbm_to_vmem [thread:$0]  (!%p4173_p6), %s5067_s13, 512, %s640_s23, [#allocation26], %s5065_s8, %s5065_s8, %s5011_s16  }
  0xd3   : > { %s5068_s15 = sld [smem:[#allocation67_spill]] }
  0xd9   : > { %s3503_s14 = scalar_lea.hbm %s5068_s15, 16 }
  0xda   : > { %p3504_p1 = scmp.ne.s32.totalorder %s5068_s15, %s3503_s14  ;;  %p3510_p12 = scmp.lt.u32.totalorder %s3503_s14, %s5068_s15 }
  0xdc   : > { %p3506_p3 = pnand %p3504_p1, %p4189_p8 }
  0xde   : > { %p3507_p11 = pneg %p3506_p3 }
  0xe0   : > { %p3512_p13 = pnand %p3510_p12, %p3507_p11 }
  0xe2   : > { %3515 = shalt.err (!%p3512_p13)
}
  0xe3   : > { %s3516_s21 = scalar_lea.vmem %s665_s28, 16  ;;  %s3523_s23 = scalar_lea.vmem %s665_s28, 32 }
  0xe4   : > { %p3517_p0 = scmp.ne.s32.totalorder %s665_s28, %s3516_s21  ;;  %p3524_p7 = scmp.lt.s32.totalorder %s665_s28, %s665_s28 }
  0xe5   : > { %p3525_p9 = scmp.lt.s32.totalorder %s3523_s23, %s3516_s21 }
  0xe6   : > { %p3519_p2 = pnand %p3517_p0, %p4189_p8 }
  0xe7   : > { %p3526_p5 = por %p3525_p9, %p3524_p7 }
  0xe8   : > { %p3520_p4 = pneg %p3519_p2 }
  0xea   : > { %p3527_p10 = pnand %p3526_p5, %p3520_p4 }
  0xec   : > { %3530 = shalt.err (!%p3527_p10)
}
  0xed   : > { %3166 = dma.hbm_to_vmem [thread:$0]  (!%p4173_p6), %s5068_s15, 16, %s665_s28, [#allocation29]  }
  0xee   : > { %s4002_s19 = smov [#allocation31]   ;;  %s5069_s17 = sld [smem:[#allocation69_spill]] }
  0xef   : > { %s686_s10 = sshll.u32 %s4002_s19, 4  ;;  %s687_s10 = int_to_ptr.vmem [resolvable:$true] %s686_s10 }
  0xf4   : > { %s3531_s25 = scalar_lea.hbm %s5069_s17, 16 }
  0xf5   : > { %p3532_p1 = scmp.ne.s32.totalorder %s5069_s17, %s3531_s25  ;;  %p3538_p12 = scmp.lt.u32.totalorder %s3531_s25, %s5069_s17 }
  0xf7   : > { %p3534_p3 = pnand %p3532_p1, %p4189_p8 }
  0xf9   : > { %p3535_p11 = pneg %p3534_p3 }
  0xfb   : > { %p3540_p13 = pnand %p3538_p12, %p3535_p11 }
  0xfd   : > { %3543 = shalt.err (!%p3540_p13)
}
  0xfe   : > { %s3544_s28 = scalar_lea.vmem %s687_s10, 16  ;;  %s3551_s23 = scalar_lea.vmem %s687_s10, 32 }
  0xff   : > { %p3545_p0 = scmp.ne.s32.totalorder %s687_s10, %s3544_s28  ;;  %p3552_p7 = scmp.lt.s32.totalorder %s687_s10, %s687_s10 }
 0x100   : > { %p3553_p9 = scmp.lt.s32.totalorder %s3551_s23, %s3544_s28 }
 0x101   : > { %p3547_p2 = pnand %p3545_p0, %p4189_p8 }
 0x102   : > { %p3554_p5 = por %p3553_p9, %p3552_p7 }
 0x103   : > { %p3548_p4 = pneg %p3547_p2 }
 0x105   : > { %p3555_p10 = pnand %p3554_p5, %p3548_p4 }
 0x107   : > { %3558 = shalt.err (!%p3555_p10)
}
 0x108   : > { %3172 = dma.hbm_to_vmem [thread:$0]  (!%p4173_p6), %s5069_s17, 16, %s687_s10, [#allocation32]  }
 0x109   : > { %s2831_s19 = sadd.s32 4294967294, %s3991_s22   ;;  %s58_s26 = sadd.s32 1, %s3987_s1 }
 0x10a   : > { %p60_p1 = scmp.ge.s32.totalorder %s58_s26, 2  ;;  %s67_s14 = sadd.s32 1, %s3979_s20 }
 0x10b   : > { %p74_p3 = scmp.ne.s32.totalorder %s3979_s20, %s3975_s30  ;;  %p75_p11 = scmp.eq.s32.totalorder %s3991_s22, 0 }
 0x10c   : > { %s5131_s26 = smov (%p60_p1, %s58_s26), 0  ;;  %p80_p13 = scmp.ne.s32.totalorder %s3975_s30, %s3971_s0 }
 0x10d   : > { %5070 = sst [smem:[#allocation50_spill]] %s5131_s26  ;;  %p4365_p12 = por %p75_p11, %p74_p3 }
 0x10e   : > { %s62_s10 = ssub.s32 %s3987_s1, %s5131_s26  ;;  %p494_p0 = scmp.eq.s32.totalorder %s4157_s2, 1 }
 0x10f   : > { %p65_p2 = scmp.eq.s32.totalorder %s62_s10, 0  ;;  %p5072_p4 = scmp.eq.s32.totalorder %s4157_s2, 0 }
 0x110   : > { %p4380_p9 = por %p494_p0, %p74_p3  ;;  %p500_p5 = scmp.eq.s32.totalorder %s2831_s19, 1 }
 0x111   : > { %p4376_p7 = por %p5072_p4, %p80_p13  ;;  %p3206_p1 = scmp.lt.s32.totalorder %s3991_s22, 2 }
 0x112   : > { %s5074_s6 = scalar_select %p4380_p9, 1, 0 }
 0x113   : > { %s5073_s27 = scalar_select %p4376_p7, 1, 0 }
 0x114   : > { %s4385_s29 = scalar_select %p65_p2, %s3979_s20, %s67_s14  }
 0x115   : > { %p4387_p10 = por %p500_p5, %p80_p13  ;;  %s4393_s28 = sand.u32 1, %s3979_s20  }
 0x116   : > { %5075 = sst [smem:[#allocation51_spill]] %s4385_s29  ;;  %s727_s23 = sand.u32 1, %s3991_s22  }
 0x117   : > { %s5076_s21 = scalar_select %p4387_p10, 1, 0 }
 0x118   : > { %p4398_p11 = pnand %p3206_p1, %p4365_p12  ;;  %s5012_s5 = sshll.u32 %s4393_s28, 2 }
 0x119   : > { %s5013_s19 = sshll.u32 %s3987_s1, 6  ;;  %s5078_s16 = sld [smem:[#allocation53_spill]] }
 0x11a   : > { %s5077_s24 = scalar_select %p4398_p11, 1, 0 }
 0x11b   : > { %s731_s9 = scalar_lea.vmem [#allocation7], %s5012_s5  ;;  %s4415_s11 = scalar_lea.sflag [#allocation8], %s727_s23 }
 0x11c   : > { %s738_s25 = sshll.u32 %s731_s9, 4  ;;  %p4421_p12 = pneg %p4398_p11  ;;  %s4413_s25 = int_to_ptr.vmem [resolvable:$true] %s738_s25 }
 0x11e   : > { %s5079_s15 = scalar_select %p4421_p12, 1, 0 }
 0x11f   : > { %s4409_s7 = scalar_lea.hbm %s5078_s16, %s5013_s19  ;;  %s3564_s5 = scalar_lea.hbm %s5078_s16, 128 }
 0x120   : > { %s3559_s13 = scalar_lea.hbm %s4409_s7, 64  ;;  %p3565_p2 = scmp.lt.u32.totalorder %s4409_s7, %s5078_s16 }
 0x121   : > { %p3560_p3 = scmp.ne.s32.totalorder %s4409_s7, %s3559_s13  ;;  %p3566_p4 = scmp.lt.u32.totalorder %s3564_s5, %s3559_s13 }
 0x122   : > { %p3568_p1 = scmp.lt.u32.totalorder %s3559_s13, %s4409_s7 }
 0x123   : > { %p3562_p13 = pnand %p4421_p12, %p3560_p3  ;;  %p3567_p5 = por %p3566_p4, %p3565_p2 }
 0x125   : > { %p3563_p0 = pneg %p3562_p13  ;;  %p3569_p10 = por %p3568_p1, %p3567_p5 }
 0x127   : > { %p3570_p9 = pnand %p3569_p10, %p3563_p0 }
 0x129   : > { %3573 = shalt.err (!%p3570_p9)
}
 0x12a   : > { %s3574_s23 = scalar_lea.vmem %s4413_s25, 64  ;;  %s4003_s14 = smov [#allocation7]  }
 0x12b   : > { %p3575_p3 = scmp.ne.s32.totalorder %s4413_s25, %s3574_s23  ;;  %s3579_s10 = sshll.u32 %s4003_s14, 4  ;;  %s3580_s10 = int_to_ptr.vmem [resolvable:$false] %s3579_s10 }
 0x12c   : > { %s3581_s19 = scalar_lea.vmem %s3580_s10, 128  ;;  %p3582_p6 = scmp.lt.s32.totalorder %s4413_s25, %s3580_s10 }
 0x12d   : > { %p3577_p13 = pnand %p3575_p3, %p4421_p12  ;;  %p3583_p8 = scmp.lt.s32.totalorder %s3581_s19, %s3574_s23 }
 0x12f   : > { %p3578_p7 = pneg %p3577_p13  ;;  %p3584_p2 = por %p3583_p8, %p3582_p6 }
 0x131   : > { %p3585_p4 = pnand %p3584_p2, %p3578_p7 }
 0x133   : > { %3588 = shalt.err (!%p3585_p4)
}
 0x134   : > { %3182 = dma.hbm_to_vmem [thread:$0]  (!%p4398_p11), %s4409_s7, 64, %s4413_s25, %s4415_s11  }
 0x135   : > { %s5080_s13 = sshll.u32 %s3987_s1, 6  ;;  %s5081_s16 = sld [smem:[#allocation54_spill]] }
 0x136   : > { %s4004_s17 = smov [#allocation12]   ;;  %s4005_s23 = smov [#allocation15]  }
 0x137   : > { %s532_s10 = sshll.u32 %s4004_s17, 4  ;;  %s559_s19 = sshll.u32 %s4005_s23, 4  ;;  %s533_s10 = int_to_ptr.vmem [resolvable:$true] %s532_s10  ;;  %s560_s19 = int_to_ptr.vmem [resolvable:$true] %s559_s19 }
 0x138   : > { %s5082_s4 = sld [smem:[#allocation56_spill]]  ;;  %p5083_p8 = scmp.ne.s32.totalorder %s5061_s12, 0 }
 0x13b   : > { %s4450_s14 = scalar_lea.hbm %s5081_s16, %s5080_s13 }
 0x13e   : > { %s3589_s29 = scalar_lea.hbm %s5082_s4, 256 }
 0x13f   : > { %p3590_p6 = scmp.ne.s32.totalorder %s5082_s4, %s3589_s29  ;;  %p3596_p10 = scmp.lt.u32.totalorder %s3589_s29, %s5082_s4 }
 0x141   : > { %p3592_p7 = pnand %p3590_p6, %p5083_p8 }
 0x143   : > { %p3593_p9 = pneg %p3592_p7 }
 0x145   : > { %p3598_p0 = pnand %p3596_p10, %p3593_p9 }
 0x147   : > { %3601 = shalt.err (!%p3598_p0)
}
 0x148   : > { %s3602_s17 = scalar_lea.vmem %s533_s10, 256  ;;  %p3610_p13 = scmp.lt.s32.totalorder %s533_s10, %s533_s10 }
 0x149   : > { %p3603_p5 = scmp.ne.s32.totalorder %s533_s10, %s3602_s17  ;;  %p3611_p2 = scmp.lt.s32.totalorder %s3602_s17, %s3602_s17 }
 0x14b   : > { %p3605_p1 = pnand %p3603_p5, %p5083_p8  ;;  %p3612_p4 = por %p3611_p2, %p3610_p13 }
 0x14d   : > { %p3606_p3 = pneg %p3605_p1 }
 0x14f   : > { %p3613_p11 = pnand %p3612_p4, %p3606_p3 }
 0x151   : > { %3616 = shalt.err (!%p3613_p11)
}
 0x152   : > { %p5084_p6 = scmp.ne.s32.totalorder %s5058_s3, 0  ;;  %s5085_s18 = smov 4  }
 0x153   : > { %s5086_s13 = sld [smem:[#allocation58_spill]] }
 0x154   : > { %3133 = dma.hbm_to_vmem [thread:$0]  (!%p5084_p6), %s5082_s4, 256, %s533_s10, [#allocation11], %s5065_s8, %s5065_s8, %s5085_s18  }
 0x159   : > { %s3617_s5 = scalar_lea.hbm %s5086_s13, 16 }
 0x15a   : > { %p3618_p7 = scmp.ne.s32.totalorder %s5086_s13, %s3617_s5  ;;  %p3624_p10 = scmp.lt.u32.totalorder %s3617_s5, %s5086_s13 }
 0x15c   : > { %p3620_p11 = pnand %p3618_p7, %p5083_p8 }
 0x15e   : > { %p3621_p9 = pneg %p3620_p11 }
 0x160   : > { %p3626_p0 = pnand %p3624_p10, %p3621_p9 }
 0x162   : > { %3629 = shalt.err (!%p3626_p0)
}
 0x163   : > { %s3630_s17 = scalar_lea.vmem %s560_s19, 16  ;;  %s3637_s8 = scalar_lea.vmem %s560_s19, 32 }
 0x164   : > { %p3631_p5 = scmp.ne.s32.totalorder %s560_s19, %s3630_s17  ;;  %p3638_p13 = scmp.lt.s32.totalorder %s560_s19, %s560_s19 }
 0x165   : > { %p3639_p2 = scmp.lt.s32.totalorder %s3637_s8, %s3630_s17 }
 0x166   : > { %p3633_p1 = pnand %p3631_p5, %p5083_p8 }
 0x167   : > { %p3640_p4 = por %p3639_p2, %p3638_p13 }
 0x168   : > { %p3634_p3 = pneg %p3633_p1 }
 0x16a   : > { %p3641_p12 = pnand %p3640_p4, %p3634_p3 }
 0x16c   : > { %3644 = shalt.err (!%p3641_p12)
}
 0x16d   : > { %3139 = dma.hbm_to_vmem [thread:$0]  (!%p5084_p6), %s5086_s13, 16, %s560_s19, [#allocation14]  }
 0x16e   : > { %s4006_s20 = smov [#allocation18]   ;;  %s4007_s26 = smov [#allocation21]  }
 0x16f   : > { %s581_s22 = sshll.u32 %s4006_s20, 4  ;;  %s605_s29 = sshll.u32 %s4007_s26, 4  ;;  %s582_s22 = int_to_ptr.vmem [resolvable:$true] %s581_s22  ;;  %s606_s29 = int_to_ptr.vmem [resolvable:$true] %s605_s29 }
 0x170   : > { %s5087_s23 = sld [smem:[#allocation60_spill]] }
 0x176   : > { %s3645_s7 = scalar_lea.hbm %s5087_s23, 16 }
 0x177   : > { %p3646_p12 = scmp.ne.s32.totalorder %s5087_s23, %s3645_s7  ;;  %p3652_p9 = scmp.lt.u32.totalorder %s3645_s7, %s5087_s23 }
 0x179   : > { %p3648_p7 = pnand %p3646_p12, %p5083_p8 }
 0x17b   : > { %p3649_p11 = pneg %p3648_p7 }
 0x17d   : > { %p3654_p10 = pnand %p3652_p9, %p3649_p11 }
 0x17f   : > { %3657 = shalt.err (!%p3654_p10)
}
 0x180   : > { %s3658_s19 = scalar_lea.vmem %s582_s22, 16  ;;  %s3665_s18 = scalar_lea.vmem %s582_s22, 32 }
 0x181   : > { %p3659_p0 = scmp.ne.s32.totalorder %s582_s22, %s3658_s19  ;;  %p3666_p3 = scmp.lt.s32.totalorder %s582_s22, %s582_s22 }
 0x182   : > { %p3667_p13 = scmp.lt.s32.totalorder %s3665_s18, %s3658_s19 }
 0x183   : > { %p3661_p5 = pnand %p3659_p0, %p5083_p8 }
 0x184   : > { %p3668_p2 = por %p3667_p13, %p3666_p3 }
 0x185   : > { %p3662_p1 = pneg %p3661_p5 }
 0x187   : > { %p3669_p4 = pnand %p3668_p2, %p3662_p1 }
 0x189   : > { %3672 = shalt.err (!%p3669_p4)
}
 0x18a   : > { %3145 = dma.hbm_to_vmem [thread:$0]  (!%p5084_p6), %s5087_s23, 16, %s582_s22, [#allocation17]  }
 0x18b   : > { %s5088_s7 = sld [smem:[#allocation62_spill]] }
 0x191   : > { %s3673_s25 = scalar_lea.hbm %s5088_s7, 16 }
 0x192   : > { %p3674_p12 = scmp.ne.s32.totalorder %s5088_s7, %s3673_s25  ;;  %p3680_p9 = scmp.lt.u32.totalorder %s3673_s25, %s5088_s7 }
 0x194   : > { %p3676_p7 = pnand %p3674_p12, %p5083_p8 }
 0x196   : > { %p3677_p11 = pneg %p3676_p7 }
 0x198   : > { %p3682_p10 = pnand %p3680_p9, %p3677_p11 }
 0x19a   : > { %3685 = shalt.err (!%p3682_p10)
}
 0x19b   : > { %s3686_s18 = scalar_lea.vmem %s606_s29, 16  ;;  %s3693_s22 = scalar_lea.vmem %s606_s29, 32 }
 0x19c   : > { %p3687_p0 = scmp.ne.s32.totalorder %s606_s29, %s3686_s18  ;;  %p3694_p3 = scmp.lt.s32.totalorder %s606_s29, %s606_s29 }
 0x19d   : > { %p3695_p13 = scmp.lt.s32.totalorder %s3693_s22, %s3686_s18 }
 0x19e   : > { %p3689_p5 = pnand %p3687_p0, %p5083_p8 }
 0x19f   : > { %p3696_p2 = por %p3695_p13, %p3694_p3 }
 0x1a0   : > { %p3690_p1 = pneg %p3689_p5 }
 0x1a2   : > { %p3697_p4 = pnand %p3696_p2, %p3690_p1 }
 0x1a4   : > { %3700 = shalt.err (!%p3697_p4)
}
 0x1a5   : > { %3151 = dma.hbm_to_vmem [thread:$0]  (!%p5084_p6), %s5088_s7, 16, %s606_s29, [#allocation20]  }
 0x1a6   : > { %s4008_s5 = smov [#allocation24]   ;;  %s4009_s25 = smov [#allocation27]  }
 0x1a7   : > { %s629_s9 = sshll.u32 %s4008_s5, 4  ;;  %s653_s17 = sshll.u32 %s4009_s25, 4  ;;  %s630_s9 = int_to_ptr.vmem [resolvable:$true] %s629_s9  ;;  %s654_s17 = int_to_ptr.vmem [resolvable:$true] %s653_s17 }
 0x1a8   : > { %s5089_s19 = sld [smem:[#allocation64_spill]] }
 0x1ae   : > { %s3701_s4 = scalar_lea.hbm %s5089_s19, 16 }
 0x1af   : > { %p3702_p12 = scmp.ne.s32.totalorder %s5089_s19, %s3701_s4  ;;  %p3708_p9 = scmp.lt.u32.totalorder %s3701_s4, %s5089_s19 }
 0x1b1   : > { %p3704_p7 = pnand %p3702_p12, %p5083_p8 }
 0x1b3   : > { %p3705_p11 = pneg %p3704_p7 }
 0x1b5   : > { %p3710_p10 = pnand %p3708_p9, %p3705_p11 }
 0x1b7   : > { %3713 = shalt.err (!%p3710_p10)
}
 0x1b8   : > { %s3714_s29 = scalar_lea.vmem %s630_s9, 16  ;;  %s3721_s26 = scalar_lea.vmem %s630_s9, 32 }
 0x1b9   : > { %p3715_p0 = scmp.ne.s32.totalorder %s630_s9, %s3714_s29  ;;  %p3722_p3 = scmp.lt.s32.totalorder %s630_s9, %s630_s9 }
 0x1ba   : > { %p3723_p13 = scmp.lt.s32.totalorder %s3721_s26, %s3714_s29 }
 0x1bb   : > { %p3717_p5 = pnand %p3715_p0, %p5083_p8 }
 0x1bc   : > { %p3724_p2 = por %p3723_p13, %p3722_p3 }
 0x1bd   : > { %p3718_p1 = pneg %p3717_p5 }
 0x1bf   : > { %p3725_p4 = pnand %p3724_p2, %p3718_p1 }
 0x1c1   : > { %3728 = shalt.err (!%p3725_p4)
}
 0x1c2   : > { %3157 = dma.hbm_to_vmem [thread:$0]  (!%p5084_p6), %s5089_s19, 16, %s630_s9, [#allocation23]  }
 0x1c3   : > { %s5090_s8 = sld [smem:[#allocation66_spill]] }
 0x1c9   : > { %s3729_s10 = scalar_lea.hbm %s5090_s8, 16 }
 0x1ca   : > { %p3730_p12 = scmp.ne.s32.totalorder %s5090_s8, %s3729_s10  ;;  %p3736_p9 = scmp.lt.u32.totalorder %s3729_s10, %s5090_s8 }
 0x1cc   : > { %p3732_p7 = pnand %p3730_p12, %p5083_p8 }
 0x1ce   : > { %p3733_p11 = pneg %p3732_p7 }
 0x1d0   : > { %p3738_p10 = pnand %p3736_p9, %p3733_p11 }
 0x1d2   : > { %3741 = shalt.err (!%p3738_p10)
}
 0x1d3   : > { %s3742_s26 = scalar_lea.vmem %s654_s17, 16  ;;  %s3749_s9 = scalar_lea.vmem %s654_s17, 32 }
 0x1d4   : > { %p3743_p0 = scmp.ne.s32.totalorder %s654_s17, %s3742_s26  ;;  %p3750_p3 = scmp.lt.s32.totalorder %s654_s17, %s654_s17 }
 0x1d5   : > { %p3751_p13 = scmp.lt.s32.totalorder %s3749_s9, %s3742_s26 }
 0x1d6   : > { %p3745_p5 = pnand %p3743_p0, %p5083_p8 }
 0x1d7   : > { %p3752_p2 = por %p3751_p13, %p3750_p3 }
 0x1d8   : > { %p3746_p1 = pneg %p3745_p5 }
 0x1da   : > { %p3753_p4 = pnand %p3752_p2, %p3746_p1 }
 0x1dc   : > { %3756 = shalt.err (!%p3753_p4)
}
 0x1dd   : > { %3163 = dma.hbm_to_vmem [thread:$0]  (!%p5084_p6), %s5090_s8, 16, %s654_s17, [#allocation26]  }
 0x1de   : > { %s4010_s4 = smov [#allocation30]   ;;  %s4011_s10 = smov [#allocation33]  }
 0x1df   : > { %s675_s13 = sshll.u32 %s4010_s4, 4  ;;  %s697_s18 = sshll.u32 %s4011_s10, 4  ;;  %s676_s13 = int_to_ptr.vmem [resolvable:$true] %s675_s13  ;;  %s698_s18 = int_to_ptr.vmem [resolvable:$true] %s697_s18 }
 0x1e0   : > { %s5091_s29 = sld [smem:[#allocation68_spill]] }
 0x1e6   : > { %s3757_s7 = scalar_lea.hbm %s5091_s29, 16 }
 0x1e7   : > { %p3758_p12 = scmp.ne.s32.totalorder %s5091_s29, %s3757_s7  ;;  %p3764_p9 = scmp.lt.u32.totalorder %s3757_s7, %s5091_s29 }
 0x1e9   : > { %p3760_p7 = pnand %p3758_p12, %p5083_p8 }
 0x1eb   : > { %p3761_p11 = pneg %p3760_p7 }
 0x1ed   : > { %p3766_p10 = pnand %p3764_p9, %p3761_p11 }
 0x1ef   : > { %3769 = shalt.err (!%p3766_p10)
}
 0x1f0   : > { %s3770_s17 = scalar_lea.vmem %s676_s13, 16  ;;  %s3777_s25 = scalar_lea.vmem %s676_s13, 32 }
 0x1f1   : > { %p3771_p0 = scmp.ne.s32.totalorder %s676_s13, %s3770_s17  ;;  %p3778_p3 = scmp.lt.s32.totalorder %s676_s13, %s676_s13 }
 0x1f2   : > { %p3779_p13 = scmp.lt.s32.totalorder %s3777_s25, %s3770_s17 }
 0x1f3   : > { %p3773_p5 = pnand %p3771_p0, %p5083_p8 }
 0x1f4   : > { %p3780_p2 = por %p3779_p13, %p3778_p3 }
 0x1f5   : > { %p3774_p1 = pneg %p3773_p5 }
 0x1f7   : > { %p3781_p4 = pnand %p3780_p2, %p3774_p1 }
 0x1f9   : > { %3784 = shalt.err (!%p3781_p4)
}
 0x1fa   : > { %3169 = dma.hbm_to_vmem [thread:$0]  (!%p5084_p6), %s5091_s29, 16, %s676_s13, [#allocation29]  }
 0x1fb   : > { %s5092_s22 = sld [smem:[#allocation70_spill]] }
 0x201   : > { %s5093_s26 = smov %s5092_s22  ;;  %s3785_s20 = scalar_lea.hbm %s5092_s22, 16 }
 0x202   : > { %p3786_p12 = scmp.ne.s32.totalorder %s5093_s26, %s3785_s20  ;;  %p3792_p9 = scmp.lt.u32.totalorder %s3785_s20, %s5093_s26 }
 0x204   : > { %p3788_p7 = pnand %p3786_p12, %p5083_p8 }
 0x206   : > { %p3789_p11 = pneg %p3788_p7 }
 0x208   : > { %p3794_p10 = pnand %p3792_p9, %p3789_p11 }
 0x20a   : > { %3797 = shalt.err (!%p3794_p10)
}
 0x20b   : > { %s3798_s4 = scalar_lea.vmem %s698_s18, 16  ;;  %s3805_s13 = scalar_lea.vmem %s698_s18, 32 }
 0x20c   : > { %p3799_p0 = scmp.ne.s32.totalorder %s698_s18, %s3798_s4  ;;  %p3806_p3 = scmp.lt.s32.totalorder %s698_s18, %s698_s18 }
 0x20d   : > { %p3807_p13 = scmp.lt.s32.totalorder %s3805_s13, %s3798_s4 }
 0x20e   : > { %p3801_p5 = pnand %p3799_p0, %p5083_p8 }
 0x20f   : > { %p3808_p2 = por %p3807_p13, %p3806_p3 }
 0x210   : > { %p3802_p1 = pneg %p3801_p5 }
 0x212   : > { %p3809_p4 = pnand %p3808_p2, %p3802_p1 }
 0x214   : > { %3812 = shalt.err (!%p3809_p4)
}
 0x215   : > { %3175 = dma.hbm_to_vmem [thread:$0]  (!%p5084_p6), %s5093_s26, 16, %s698_s18, [#allocation32]  }
 0x216   : > { %s2850_s12 = sshll.u32 %s4393_s28, 3  ;;  %s2851_s19 = sshll.u32 %s3987_s1, 7 }
 0x217   : > { %s5094_s9 = sld [smem:[#allocation52_spill]]  ;;  %s712_s3 = scalar_lea.vmem [#allocation4], %s2850_s12 }
 0x218   : > { %s720_s17 = sshll.u32 %s712_s3, 4  ;;  %s5095_s25 = sshll.u32 %s4393_s28, 2  ;;  %s4608_s17 = int_to_ptr.vmem [resolvable:$true] %s720_s17 }
 0x219   : > { %s749_s4 = scalar_lea.vmem [#allocation9], %s5095_s25  ;;  %s709_s18 = scalar_lea.sflag [#allocation5], %s4393_s28 }
 0x21a   : > { %s756_s13 = sshll.u32 %s749_s4, 4  ;;  %p5096_p6 = scmp.ne.s32.totalorder %s5079_s15, 0  ;;  %s4610_s13 = int_to_ptr.vmem [resolvable:$true] %s756_s13 }
 0x21d   : > { %s4604_s5 = scalar_lea.hbm %s5094_s9, %s2851_s19  ;;  %s3818_s22 = scalar_lea.hbm %s5094_s9, 256 }
 0x21e   : > { %s3813_s10 = scalar_lea.hbm %s4604_s5, 128  ;;  %p3819_p11 = scmp.lt.u32.totalorder %s4604_s5, %s5094_s9 }
 0x21f   : > { %p3814_p8 = scmp.ne.s32.totalorder %s4604_s5, %s3813_s10  ;;  %p3820_p9 = scmp.lt.u32.totalorder %s3818_s22, %s3813_s10 }
 0x220   : > { %p3822_p0 = scmp.lt.u32.totalorder %s3813_s10, %s4604_s5 }
 0x221   : > { %p3816_p12 = pnand %p3814_p8, %p5096_p6  ;;  %p3821_p10 = por %p3820_p9, %p3819_p11 }
 0x223   : > { %p3817_p7 = pneg %p3816_p12  ;;  %p3823_p5 = por %p3822_p0, %p3821_p10 }
 0x225   : > { %p3824_p1 = pnand %p3823_p5, %p3817_p7 }
 0x227   : > { %3827 = shalt.err (!%p3824_p1)
}
 0x228   : > { %s3828_s28 = scalar_lea.vmem %s4608_s17, 128  ;;  %s4012_s3 = smov [#allocation4]  }
 0x229   : > { %p3829_p3 = scmp.ne.s32.totalorder %s4608_s17, %s3828_s28  ;;  %s3833_s25 = sshll.u32 %s4012_s3, 4  ;;  %s3834_s25 = int_to_ptr.vmem [resolvable:$false] %s3833_s25 }
 0x22a   : > { %s3835_s4 = scalar_lea.vmem %s3834_s25, 256  ;;  %p3836_p4 = scmp.lt.s32.totalorder %s4608_s17, %s3834_s25 }
 0x22b   : > { %p3831_p13 = pnand %p3829_p3, %p5096_p6  ;;  %p3837_p8 = scmp.lt.s32.totalorder %s3835_s4, %s3828_s28 }
 0x22d   : > { %p3832_p2 = pneg %p3831_p13  ;;  %p3838_p12 = por %p3837_p8, %p3836_p4 }
 0x22f   : > { %p3839_p11 = pnand %p3838_p12, %p3832_p2 }
 0x231   : > { %3842 = shalt.err (!%p3839_p11)
}
 0x232   : > { %p5097_p7 = scmp.ne.s32.totalorder %s5077_s24, 0  ;;  %s3843_s10 = scalar_lea.hbm %s4450_s14, 64 }
 0x233   : > { %p3844_p9 = scmp.ne.s32.totalorder %s4450_s14, %s3843_s10  ;;  %s3848_s22 = scalar_lea.hbm %s5081_s16, 128 }
 0x234   : > { %3179 = dma.hbm_to_vmem [thread:$0]  (!%p5097_p7), %s4604_s5, 128, %s4608_s17, %s709_s18  }
 0x235   : > { %p3846_p10 = pnand %p3844_p9, %p5096_p6  ;;  %p3849_p5 = scmp.lt.u32.totalorder %s4450_s14, %s5081_s16 }
 0x236   : > { %p3850_p1 = scmp.lt.u32.totalorder %s3848_s22, %s3843_s10  ;;  %p3852_p13 = scmp.lt.u32.totalorder %s3843_s10, %s4450_s14 }
 0x237   : > { %p3847_p0 = pneg %p3846_p10 }
 0x238   : > { %p3851_p3 = por %p3850_p1, %p3849_p5 }
 0x23a   : > { %p3853_p2 = por %p3852_p13, %p3851_p3 }
 0x23c   : > { %p3854_p4 = pnand %p3853_p2, %p3847_p0 }
 0x23e   : > { %3857 = shalt.err (!%p3854_p4)
}
 0x23f   : > { %s3858_s5 = scalar_lea.vmem %s4610_s13, 64  ;;  %s4013_s17 = smov [#allocation9]  }
 0x240   : > { %p3859_p8 = scmp.ne.s32.totalorder %s4610_s13, %s3858_s5  ;;  %s3863_s18 = sshll.u32 %s4013_s17, 4  ;;  %s3864_s18 = int_to_ptr.vmem [resolvable:$false] %s3863_s18 }
 0x241   : > { %s3865_s28 = scalar_lea.vmem %s3864_s18, 128  ;;  %p3866_p9 = scmp.lt.s32.totalorder %s4610_s13, %s3864_s18 }
 0x242   : > { %p3861_p12 = pnand %p3859_p8, %p5096_p6  ;;  %p3867_p10 = scmp.lt.s32.totalorder %s3865_s28, %s3858_s5 }
 0x244   : > { %p3862_p11 = pneg %p3861_p12  ;;  %p3868_p5 = por %p3867_p10, %p3866_p9 }
 0x246   : > { %p3869_p1 = pnand %p3868_p5, %p3862_p11 }
 0x248   : > { %3872 = shalt.err (!%p3869_p1)
}
 0x249   : > { %3185 = dma.hbm_to_vmem [thread:$0]  (!%p5097_p7), %s4450_s14, 64, %s4610_s13, %s4415_s11  }
 0x24a   : > { %s5098_s3 = sld [smem:[#allocation49_spill]] }
 0x250   : > { %p5099_p0 = scmp.ne.s32.totalorder %s5098_s3, 0 }
 0x251   : > { %s4659_s15 = sand.u32 (!%p5099_p0), 1, %s3975_s30   ;;  %p5100_p6 = scmp.ne.s32.totalorder (!%p5099_p0), %s5073_s27, 0 }
 0x252   : > { %765 = sbr.rel (%p5099_p0) target bundleno = 3205 (0xc85), region = 96  ;;  %s2857_s25 = sshll.u32 (!%p5099_p0), %s4659_s15, 3 }
 0x253   : > { %s768_s4 = scalar_lea.sflag (!%p5099_p0), [#allocation5], %s4659_s15  ;;  %s4665_s10 = scalar_lea.vmem (!%p5099_p0), [#allocation4], %s2857_s25 }
 0x259   : > { %3926 = dma.done.wait (%p5100_p6), %s768_s4, 128  }
 0x25a   : > { %3928 = vsyncadd (%p5100_p6), %s768_s4, 4294967168  ;;  %s776_s11 = sand.u32 1, %s4157_s2   ;;  %s2858_s24 = sshll.u32 %s4659_s15, 2 }
 0x25b   : > { %s777_s14 = scalar_lea.sflag [#allocation8], %s776_s11  ;;  %s4673_s13 = scalar_lea.vmem [#allocation7], %s2858_s24 }
 0x25c   : > { %3930 = dma.done.wait (%p5100_p6), %s777_s14, 128  }
 0x25d   : > { %3932 = vsyncadd (%p5100_p6), %s777_s14, 4294967168  ;;  %s4679_s7 = scalar_lea.vmem [#allocation9], %s2858_s24  ;;  %p5101_p7 = scmp.eq.s32.totalorder %s4157_s2, 0 }
 0x25f   : > { %3934 = dma.done.wait (%p5101_p7), [#allocation11], 512   ;;  %p5102_p3 = pmov %p5101_p7 }
 0x261   : > { %3936 = vsyncadd (%p5102_p3), [#allocation11], 4294966784  ;;  %p5103_p13 = pmov %p5102_p3 }
 0x262   : > { %p5104_p2 = pmov %p5102_p3 }
 0x263   : > { %3938 = dma.done.wait (%p5103_p13), [#allocation14], 272  }
 0x264   : > { %3940 = vsyncadd (%p5104_p2), [#allocation14], 4294967024  ;;  %p5105_p4 = pmov %p5104_p2 }
 0x265   : > { %p5106_p8 = pmov %p5104_p2 }
 0x266   : > { %3942 = dma.done.wait (%p5105_p4), [#allocation17], 32  }
 0x267   : > { %3944 = vsyncadd (%p5106_p8), [#allocation17], 4294967264  ;;  %p5107_p12 = pmov %p5104_p2 }
 0x268   : > { %p5108_p11 = pmov %p5104_p2 }
 0x269   : > { %3946 = dma.done.wait (%p5107_p12), [#allocation20], 272  }
 0x26a   : > { %3948 = vsyncadd (%p5108_p11), [#allocation20], 4294967024  ;;  %p5109_p9 = pmov %p5104_p2 }
 0x26b   : > { %p5110_p10 = pmov %p5104_p2 }
 0x26c   : > { %3950 = dma.done.wait (%p5109_p9), [#allocation23], 272  }
 0x26d   : > { %3952 = vsyncadd (%p5110_p10), [#allocation23], 4294967024  ;;  %p5111_p5 = pmov %p5104_p2 }
 0x26e   : > { %p5112_p1 = pmov %p5104_p2 }
 0x26f   : > { %3954 = dma.done.wait (%p5111_p5), [#allocation26], 528  }
 0x270   : > { %3956 = vsyncadd (%p5112_p1), [#allocation26], 4294966768  ;;  %p5113_p0 = pmov %p5112_p1 }
 0x272   : > { %3958 = dma.done.wait (%p5113_p0), [#allocation29], 32   ;;  %p5114_p6 = pmov %p5113_p0 }
 0x273   : > { %p5115_p7 = pmov %p5113_p0 }
 0x274   : > { %3960 = vsyncadd (%p5114_p6), [#allocation29], 4294967264 }
 0x275   : > { %3962 = dma.done.wait (%p5115_p7), [#allocation32], 32   ;;  %p5116_p3 = pmov %p5113_p0 }
 0x276   : > { %v4014_v0 = vmov 0.0   ;;  %vm4015_vm0 = vmmov 0   ;;  %v3301_v1 = vld [vmem:[#allocation12] sm:$0xff]   ;;  %v3302_v2 = vld [vmem:[#allocation12 + $0x8] sm:$0xff]   ;;  %vm947_vm1 = vcmask 261120   ;;  %v3303_v4 = vld [vmem:[#allocation10] sm:$0xff]   ;;  %v1069_v26 = vlaneseq }
 0x277   : > { %3964 = vsyncadd (%p5116_p3), [#allocation32], 4294967264  ;;  %2955 = vmatprep.subr.bf16.mxu0 %v4014_v0  ;;  %2959 = vmatprep.mubr.msk.bf16.mxu0 %vm4015_vm0, %v4014_v0  ;;  %v923_v3 = vld [vmem:[%s4673_s13] sm:$0xf]  ;;  %v3304_v5 = vld [vmem:[#allocation10 + $0x8] sm:$0xff]   ;;  %s4016_s2 = smov 104  }
 0x278   : > { %2963 = vmatprep.subr.bf16.mxu1 %v4014_v0  ;;  %2967 = vmatprep.mubr.msk.bf16.mxu1 %vm4015_vm0, %v4014_v0  ;;  %v1418_v6 = vld [vmem:[%s4673_s13] sm:$0xf]  ;;  %s4017_s27 = smov 120   ;;  %s4018_s19 = smov 112   ;;  %v3305_v21 = vld [vmem:[#allocation13] sm:$0xff]   ;;  %v3306_v22 = vld [vmem:[#allocation13 + $0x8] sm:$0xff]  }
 0x279   : > { %2956 = vmatpush3.bf16.msra.mxu0 %v3301_v1  ;;  %v2877_v7 = vld [vmem:[#allocation16] ss:$0 sm:$0xff]  ;;  %v2885_v14 = vld [vmem:[#allocation15] ss:$0 sm:$0xff]  ;;  %2964 = vmatpush3.bf16.msra.mxu1 %v3305_v21  ;;  %v991_v23 = vld [vmem:[%s4679_s7] sm:$0xf] }
 0x27a   : > { %2957 = vmatprep.subr.bf16.mxu0 %v4014_v0  ;;  %2965 = vmatprep.subr.bf16.mxu1 %v4014_v0  ;;  %v4019_v24 = vmov 1983009808   ;;  %v4020_v27 = vmov 1934713408   ;;  %v1070_v30 = vshrl.u32 %v1069_v26, 7  ;;  %v4021_v45 = vmov 0  }
 0x27b   : > { %v1067_v25 = vunpack.c.l.s4 %v4019_v24  ;;  %v1084_v28 = vunpack.c.l.s4 %v4020_v27  ;;  %vm1231_vm2 = vcmask 60416   ;;  %vm1659_vm3 = vcmask 64512   ;;  %s4022_s22 = smov 8   ;;  %s4023_s20 = smov 16  }
 0x27c   : > { %vm1899_vm4 = vcmask 1043456   ;;  %s4024_s12 = smov 24   ;;  %vm2252_vm5 = vcmask 130048   ;;  %vm2255_vm6 = vcmask 195584   ;;  %vm2463_vm7 = vcmask 523264   ;;  %s5117_s5 = sld [smem:[#allocation47_spill]] }
 0x27d   : > { %2958 = vmatpush3.bf16.msra.mxu0 %v3302_v2  ;;  %2966 = vmatpush3.bf16.msra.mxu1 %v3306_v22  ;;  %v1068_v29 = vunpack.c.0.s8 %v1067_v25  ;;  %v1085_v31 = vunpack.c.0.s8 %v1084_v28  ;;  %s917_s18 = scalar_lea.vmem [#allocation34], %s2857_s25  ;;  %s2539_s24 = scalar_lea.sflag [#allocation6], %s4659_s15 }
 0x27e   : > { %2971 = vmatprep.subr.bf16.mxu0 %v4014_v0  ;;  %2979 = vmatprep.subr.bf16.mxu1 %v4014_v0  ;;  %s2553_s28 = sshll.u32 %s917_s18, 4  ;;  %p5119_p2 = scmp.ne.s32.totalorder %s5074_s6, 0  ;;  %s4926_s28 = int_to_ptr.vmem [resolvable:$true] %s2553_s28 }
 0x27f   : > { %v4743_v32 = vsub.s32 %v1068_v29, %v1070_v30  ;;  %v4746_v36 = vsub.s32 %v1085_v31, %v1070_v30  ;;  %s3873_s14 = scalar_lea.vmem %s4926_s28, 128  ;;  %s4025_s25 = smov [#allocation34]  }
 0x280   : > { %2960 = vmatmul.mubr.msk.bf16.vlgmr.msra.gmra.mrb[0].mxu0 %vm947_vm1, %v923_v3  ;;  %2968 = vmatmul.mubr.msk.bf16.vlgmr.msra.gmra.mrb[0].mxu1 %vm947_vm1, %v991_v23  ;;  %p3874_p13 = scmp.ne.s32.totalorder %s4926_s28, %s3873_s14  ;;  %s3877_s13 = sshll.u32 %s4025_s25, 4  ;;  %s3878_s13 = int_to_ptr.vmem [resolvable:$false] %s3877_s13 }
 0x281   : > { %2972 = vmatpush3.bf16.msra.mxu0 %v3303_v4  ;;  %2975 = vmatprep.mubr.msk.bf16.mxu0 %vm4015_vm0, %v4014_v0  ;;  %s3879_s7 = scalar_lea.vmem %s3878_s13, 256  ;;  %p3880_p12 = scmp.lt.s32.totalorder %s4926_s28, %s3878_s13 }
 0x282   : > { %2973 = vmatprep.subr.bf16.mxu0 %v4014_v0  ;;  %2981 = vmatprep.mubr.msk.bf16.mxu1 %vm4015_vm0, %v4014_v0  ;;  %s2916_s17 = sshll.u32 %s5117_s5, 7  ;;  %p3875_p4 = pnand %p3874_p13, %p5119_p2 }
 0x283   : > { %p3881_p11 = scmp.lt.s32.totalorder %s3879_s7, %s3873_s14 }
 0x284   : > { %p3876_p8 = pneg %p3875_p4 }
 0x285   : > { %2974 = vmatpush3.bf16.msra.mxu0 %v3304_v5  ;;  %p3882_p9 = por %p3881_p11, %p3880_p12 }
 0x286   : > { %2985 = vmatprep.subr.bf16.mxu0 %v4014_v0 }
 0x287   : > { %p3883_p10 = pnand %p3882_p9, %p3876_p8 }
 0x288   : > { %2976 = vmatmul.mubr.msk.bf16.vlgmr.msra.gmra.mrb[4].mxu0 %vm947_vm1, %v1418_v6 }
 0x289   : > { %2987 = vmatprep.mubr.msk.bf16.mxu0 %vm4015_vm0, %v4014_v0 }
 0x353   : > { %v985_v8 = vpop.f32.mrb[0].mxu0 }
 0x354   : > { %v986_v9 = vadd.f32 %v2877_v7, %v985_v8  ;;  %v2961_v10 = vpop.f32.mrb[1].mxu0 }
 0x355   : > { %v988_v11 = vpop.f32.mrb[2].mxu0 }
 0x356   : > { %v1058_v12 = vpack.c.bf16 %v986_v9, %v986_v9  ;;  %v2962_v13 = vpop.f32.mrb[3].mxu0 }
 0x358   : > { %1064 = vrot.lane.b32.xlu1 %v1058_v12, %s4016_s2  ;;  %1060 = vrot.lane.b32.xlu0 %v1058_v12, %s4017_s27  ;;  %v1072_v44 = vrot.slane %v1058_v12, %v4743_v32 }
 0x35b   : > { %v1480_v15 = vpop.f32.mrb[4].mxu0 }
 0x35c   : > { %v1481_v16 = vadd.f32 %v2885_v14, %v1480_v15  ;;  %1062 = vrot.lane.b32.xlu0 %v1058_v12, %s4018_s19  ;;  %v2977_v17 = vpop.f32.mrb[5].mxu0 }
 0x35d   : > { %v1483_v18 = vpop.f32.mrb[6].mxu0 }
 0x35e   : > { %v1486_v19 = vpack.c.bf16 %v1481_v16, %v1481_v16  ;;  %v2978_v20 = vpop.f32.mrb[7].mxu0 }
 0x360   : > { %1490 = vrot.lane.b32.xlu0 %v1486_v19, %s4018_s19  ;;  %1488 = vrot.lane.b32.xlu1 %v1486_v19, %s4017_s27  ;;  %v1500_v51 = vrot.slane %v1486_v19, %v4743_v32 }
 0x364   : > { %1492 = vrot.lane.b32.xlu1 %v1486_v19, %s4016_s2 }
 0x3ca   : > { %v1065_v33 = vpop.permute.xlu1 %1064  ;;  %v1061_v34 = vpop.permute.xlu0 %1060 }
 0x3cb   : > { %v1114_v35 = vrot.slane %v1065_v33, %v4743_v32  ;;  %v1106_v37 = vrot.slane %v1061_v34, %v4743_v32 }
 0x3cd   : > { %v1115_v38 = vcombine.low %v1106_v37, %v1114_v35  ;;  %v1116_v39 = vcombine.high %v1106_v37, %v1114_v35 }
 0x3ce   : > { %v1063_v40 = vpop.permute.xlu0 %1062 }
 0x3cf   : > { %v1123_v41 = vrot.slane %v1115_v38, %v4746_v36  ;;  %v1130_v42 = vrot.slane %v1116_v39, %v4746_v36  ;;  %v1080_v43 = vrot.slane %v1063_v40, %v4743_v32 }
 0x3d1   : > { %v1131_v46 = vcombine.high %v1123_v41, %v4021_v45  ;;  %v1081_v47 = vcombine.low %v1072_v44, %v1080_v43  ;;  %v1082_v48 = vcombine.high %v1072_v44, %v1080_v43  ;;  %v1132_v50 = vcombine.high %v1130_v42, %v4021_v45 }
 0x3d2   : > { %v1491_v49 = vpop.permute.xlu0 %1490  ;;  %v1489_v53 = vpop.permute.xlu1 %1488  ;;  %v1138_v54 = vshrl.u32 %v1123_v41, 16  ;;  %v1154_v58 = vshrl.u32 %v1130_v42, 16 }
 0x3d3   : > { %v1508_v52 = vrot.slane %v1491_v49, %v4743_v32  ;;  %v1089_v55 = vrot.slane %v1081_v47, %v4746_v36  ;;  %v1096_v56 = vrot.slane %v1082_v48, %v4746_v36  ;;  %v1146_v57 = vshrl.u32 %v1131_v46, 16 }
 0x3d4   : > { %v1162_v2 = vshrl.u32 %v1132_v50, 16  ;;  %v1534_v17 = vrot.slane %v1489_v53, %v4743_v32 }
 0x3d5   : > { %v1509_v59 = vcombine.low %v1500_v51, %v1508_v52  ;;  %v1510_v60 = vcombine.high %v1500_v51, %v1508_v52  ;;  %v1097_v61 = vcombine.high %v1089_v55, %v4021_v45  ;;  %v1098_v62 = vcombine.high %v1096_v56, %v4021_v45 }
 0x3d6   : > { %v1135_v63 = vpack.i.b16 %v1123_v41, %v1089_v55  ;;  %v1137_v1 = vshrl.u32 %v1089_v55, 16  ;;  %v1151_v3 = vpack.i.b16 %v1130_v42, %v1096_v56  ;;  %v1153_v4 = vshrl.u32 %v1096_v56, 16  ;;  %v1493_v14 = vpop.permute.xlu1 %1492 }
 0x3d7   : > { %v1517_v5 = vrot.slane %v1509_v59, %v4746_v36  ;;  %v1143_v7 = vpack.i.b16 %v1131_v46, %v1097_v61  ;;  %v1145_v8 = vshrl.u32 %v1097_v61, 16  ;;  %v1159_v9 = vpack.i.b16 %v1132_v50, %v1098_v62 }
 0x3d8   : > { %v1139_v6 = vpack.i.b16 %v1138_v54, %v1137_v1  ;;  %v1155_v10 = vpack.i.b16 %v1154_v58, %v1153_v4  ;;  %v1161_v11 = vshrl.u32 %v1098_v62, 16  ;;  %v1165_v12 = vcombine.low %v1135_v63, %v1151_v3 }
 0x3d9   : > { %v1524_v13 = vrot.slane %v1510_v60, %v4746_v36  ;;  %v1147_v15 = vpack.i.b16 %v1146_v57, %v1145_v8  ;;  %v1173_v16 = vcombine.low %v1143_v7, %v1159_v9  ;;  %v1542_v22 = vrot.slane %v1493_v14, %v4743_v32 }
 0x3da   : > { %v1163_v18 = vpack.i.b16 %v1162_v2, %v1161_v11  ;;  %v1190_v19 = vcombine.low %v1139_v6, %v1155_v10  ;;  %v1172_v20 = vrot.slane %v1165_v12, %v4743_v32  ;;  %v1525_v24 = vcombine.high %v1517_v5, %v4021_v45 }
 0x3db   : > { %v1180_v21 = vrot.slane %v1173_v16, %v4743_v32  ;;  %v1526_v25 = vcombine.high %v1524_v13, %v4021_v45  ;;  %v1543_v27 = vcombine.low %v1534_v17, %v1542_v22  ;;  %v1544_v28 = vcombine.high %v1534_v17, %v1542_v22 }
 0x3dc   : > { %v1198_v23 = vcombine.low %v1147_v15, %v1163_v18  ;;  %v1197_v29 = vrot.slane %v1190_v19, %v4743_v32  ;;  %v1565_v33 = vshrl.u32 %v1517_v5, 16  ;;  %v1573_v38 = vshrl.u32 %v1525_v24, 16 }
 0x3dd   : > { %v1181_v26 = vcombine.low %v1172_v20, %v1180_v21  ;;  %v1551_v34 = vrot.slane %v1543_v27, %v4746_v36  ;;  %v1558_v35 = vrot.slane %v1544_v28, %v4746_v36  ;;  %v1581_v39 = vshrl.u32 %v1524_v13, 16 }
 0x3de   : > { %v1205_v30 = vrot.slane %v1198_v23, %v4743_v32  ;;  %v1589_v40 = vshrl.u32 %v1526_v25, 16 }
 0x3df   : > { %v1188_v31 = vrot.slane %v1181_v26, %v4746_v36  ;;  %v1559_v43 = vcombine.high %v1551_v34, %v4021_v45  ;;  %v1560_v44 = vcombine.high %v1558_v35, %v4021_v45  ;;  %v1563_v47 = vpack.i.b16 %v1551_v34, %v1517_v5 }
 0x3e0   : > { %v1206_v37 = vcombine.low %v1197_v29, %v1205_v30  ;;  %v1566_v48 = vshrl.u32 %v1551_v34, 16  ;;  %v1579_v49 = vpack.i.b16 %v1558_v35, %v1524_v13  ;;  %v1582_v53 = vshrl.u32 %v1558_v35, 16  ;;  %v1052_v35 = vpop.f32.mrb[0].mxu1 }
 0x3e1   : > { %v1189_v41 = vcombine.high %v1188_v31, %v4021_v45  ;;  %v1219_v42 = vshrl.u32 %v1188_v31, 16  ;;  %v1571_v51 = vpack.i.b16 %v1559_v43, %v1525_v24  ;;  %v1574_v52 = vshrl.u32 %v1559_v43, 16 }
 0x3e2   : > { %v1213_v46 = vrot.slane %v1206_v37, %v4746_v36  ;;  %v1567_v57 = vpack.i.b16 %v1566_v48, %v1565_v33  ;;  %v1583_v59 = vpack.i.b16 %v1582_v53, %v1581_v39  ;;  %v1587_v60 = vpack.i.b16 %v1560_v44, %v1526_v25  ;;  %v2969_v37 = vpop.f32.mrb[1].mxu1 }
 0x3e3   : > { %v1227_v50 = vshrl.u32 %v1189_v41, 16  ;;  %v1575_v58 = vpack.i.b16 %v1574_v52, %v1573_v38  ;;  %v1590_v61 = vshrl.u32 %v1560_v44, 16  ;;  %v1593_v2 = vcombine.low %v1563_v47, %v1579_v49  ;;  %v1055_v38 = vpop.f32.mrb[2].mxu1 }
 0x3e4   : > { %v1214_v54 = vcombine.high %v1213_v46, %v4021_v45  ;;  %v1217_v55 = vpack.i.b16 %v1213_v46, %v1188_v31  ;;  %v1220_v56 = vshrl.u32 %v1213_v46, 16  ;;  %v1601_v4 = vcombine.low %v1571_v51, %v1587_v60  ;;  %v2970_v39 = vpop.f32.mrb[3].mxu1 }
 0x3e5   : > { %v1591_v3 = vpack.i.b16 %v1590_v61, %v1589_v40  ;;  %v1618_v5 = vcombine.low %v1567_v57, %v1583_v59  ;;  %v1600_v9 = vrot.slane %v1593_v2, %v4743_v32 }
 0x3e6   : > { %v1221_v62 = vpack.i.b16 %v1220_v56, %v1219_v42  ;;  %v1225_v63 = vpack.i.b16 %v1214_v54, %v1189_v41  ;;  %v1228_v1 = vshrl.u32 %v1214_v54, 16  ;;  %1232 = vst.msk [vmem:[#allocation2] sm:$0xf] %vm1231_vm2, %v1217_v55  ;;  %v1608_v7 = vrot.slane %v1601_v4, %v4743_v32 }
 0x3e7   : > { %v1626_v8 = vcombine.low %v1575_v58, %v1591_v3  ;;  %v1625_v10 = vrot.slane %v1618_v5, %v4743_v32  ;;  %v2881_v58 = vld [vmem:[#allocation18] ss:$0 sm:$0xff] }
 0x3e8   : > { %v1229_v6 = vpack.i.b16 %v1228_v1, %v1227_v50  ;;  %1233 = vst.msk [vmem:[#allocation2 + $0x4] sm:$0xf] %vm1231_vm2, %v1221_v62  ;;  %1234 = vst.msk [vmem:[#allocation2 + $0x8] sm:$0xf] %vm1231_vm2, %v1225_v63  ;;  %v1609_v12 = vcombine.low %v1600_v9, %v1608_v7  ;;  %v1053_v62 = vadd.f32 %v2881_v58, %v1052_v35 }
 0x3e9   : > { %v1633_v11 = vrot.slane %v1626_v8, %v4743_v32 }
 0x3ea   : > { %1235 = vst.msk [vmem:[#allocation2 + $0xc] sm:$0xf] %vm1231_vm2, %v1229_v6  ;;  %v1616_v19 = vrot.slane %v1609_v12, %v4746_v36  ;;  %v1236_v63 = vpack.c.bf16 %v1053_v62, %v1053_v62 }
 0x3eb   : > { %v1634_v13 = vcombine.low %v1625_v10, %v1633_v11 }
 0x3ec   : > { %v1646_v23 = vshrl.u32 %v1616_v19, 16  ;;  %v1617_v29 = vcombine.high %v1616_v19, %v4021_v45 }
 0x3ed   : > { %v1655_v14 = vld [vmem:[#allocation2] sm:$0xf]  ;;  %v1641_v17 = vrot.slane %v1634_v13, %v4746_v36 }
 0x3ee   : > { %v1664_v15 = vsel %vm1659_vm3, %v1655_v14, 0  ;;  %v1652_v33 = vshrl.u32 %v1617_v29, 16 }
 0x3ef   : > { %2980 = vmatpush3.bf16.xpose.msra.mxu1 %v1664_v15  ;;  %v1656_v16 = vld [vmem:[#allocation2 + $0x4] sm:$0xf]  ;;  %v1647_v20 = vshrl.u32 %v1641_v17, 16  ;;  %v1657_v21 = vld [vmem:[#allocation2 + $0x8] sm:$0xf]  ;;  %v1645_v22 = vpack.i.b16 %v1641_v17, %v1616_v19  ;;  %v1642_v27 = vcombine.high %v1641_v17, %v4021_v45 }
 0x3f0   : > { %v1710_v18 = vsel %vm1659_vm3, %v1656_v16, 0  ;;  %2991 = vmatprep.subr.bf16.mxu1 %v4014_v0  ;;  %v1756_v25 = vsel %vm1659_vm3, %v1657_v21, 0 }
 0x3f1   : > { %2986 = vmatpush3.bf16.xpose.msra.mxu0 %v1710_v18  ;;  %v1658_v24 = vld [vmem:[#allocation2 + $0xc] sm:$0xf]  ;;  %v1648_v26 = vpack.i.b16 %v1647_v20, %v1646_v23  ;;  %v1653_v30 = vshrl.u32 %v1642_v27, 16  ;;  %v1651_v31 = vpack.i.b16 %v1642_v27, %v1617_v29 }
 0x3f2   : > { %2997 = vmatprep.subr.bf16.mxu0 %v4014_v0  ;;  %v1802_v28 = vsel %vm1659_vm3, %v1658_v24, 0  ;;  %v1250_v24 = vrot.slane %v1236_v63, %v4743_v32 }
 0x3f3   : > { %v1654_v34 = vpack.i.b16 %v1653_v30, %v1652_v33 }
 0x3f6   : > { %2982 = vmatmul.mubr.msk.bf16.vlgmr.msra.gmra.mrb[4].mxu1 %vm1659_vm3, %v1645_v22 }
 0x3f7   : > { %2992 = vmatpush3.bf16.xpose.msra.mxu1 %v1756_v25  ;;  %2993 = vmatprep.mubr.msk.bf16.mxu1 %vm4015_vm0, %v4014_v0 }
 0x3f8   : > { %2988 = vmatmul.mubr.msk.bf16.vlgmr.msra.gmra.mrb[8].mxu0 %vm1659_vm3, %v1648_v26  ;;  %3003 = vmatprep.subr.bf16.mxu1 %v4014_v0 }
 0x3f9   : > { %2998 = vmatpush3.bf16.xpose.msra.mxu0 %v1802_v28  ;;  %2999 = vmatprep.mubr.msk.bf16.mxu0 %vm4015_vm0, %v4014_v0 }
 0x3fa   : > { %3009 = vmatprep.subr.bf16.mxu0 %v4014_v0 }
 0x3fe   : > { %2994 = vmatmul.mubr.msk.bf16.vlgmr.msra.gmra.mrb[8].mxu1 %vm1659_vm3, %v1651_v31 }
 0x3ff   : > { %3005 = vmatprep.mubr.msk.bf16.mxu1 %vm4015_vm0, %v4014_v0 }
 0x400   : > { %3000 = vmatmul.mubr.msk.bf16.vlgmr.msra.gmra.mrb[12].mxu0 %vm1659_vm3, %v1654_v34 }
 0x401   : > { %3011 = vmatprep.mubr.msk.bf16.mxu0 %vm4015_vm0, %v4014_v0 }
 0x4c9   : > { %v1700_v40 = vpop.f32.mrb[4].mxu1 }
 0x4ca   : > { %v2983_v41 = vpop.f32.mrb[5].mxu1  ;;  %v1844_v42 = vsel %vm1659_vm3, %v1700_v40, -inf }
 0x4cb   : > { %1845 = vmax.xlane.f32.xlu0 %v1844_v42  ;;  %v1703_v43 = vpop.f32.mrb[6].mxu1  ;;  %v1746_v44 = vpop.f32.mrb[8].mxu0 }
 0x4cc   : > { %v2984_v46 = vpop.f32.mrb[7].mxu1  ;;  %v2989_v47 = vpop.f32.mrb[9].mxu0  ;;  %v1847_v48 = vsel %vm1659_vm3, %v1746_v44, -inf }
 0x4cd   : > { %1848 = vmax.xlane.f32.xlu1 %v1847_v48  ;;  %v1749_v49 = vpop.f32.mrb[10].mxu0 }
 0x4ce   : > { %v2990_v50 = vpop.f32.mrb[11].mxu0 }
 0x4d1   : > { %v1792_v51 = vpop.f32.mrb[8].mxu1 }
 0x4d2   : > { %v2995_v52 = vpop.f32.mrb[9].mxu1  ;;  %v1850_v53 = vsel %vm1659_vm3, %v1792_v51, -inf }
 0x4d3   : > { %1851 = vmax.xlane.f32.xlu0 %v1850_v53  ;;  %v1795_v54 = vpop.f32.mrb[10].mxu1  ;;  %v1838_v55 = vpop.f32.mrb[12].mxu0 }
 0x4d4   : > { %v2996_v56 = vpop.f32.mrb[11].mxu1  ;;  %v3001_v57 = vpop.f32.mrb[13].mxu0  ;;  %v1853_v61 = vsel %vm1659_vm3, %v1838_v55, -inf }
 0x4d5   : > { %v1841_v59 = vpop.f32.mrb[14].mxu0 }
 0x4d6   : > { %v3002_v60 = vpop.f32.mrb[15].mxu0 }
 0x4d7   : > { %1854 = vmax.xlane.f32.xlu0 %v1853_v61 }
 0x4de   : > { %1238 = vrot.lane.b32.xlu1 %v1236_v63, %s4017_s27 }
 0x4e2   : > { %1242 = vrot.lane.b32.xlu1 %v1236_v63, %s4016_s2 }
 0x4ed   : > { %1240 = vrot.lane.b32.xlu0 %v1236_v63, %s4018_s19 }
 0x558   : > { %v1846_v1 = vpop.xlane.xlu0 %1845 }
 0x559   : > { %v1856_v2 = vsub.f32 %v1700_v40, %v1846_v1 }
 0x55a   : > { %v1849_v3 = vpop.xlane.xlu1 %1848 }
 0x55b   : > { %v1860_v4 = vmul.f32 1.442695, %v1856_v2  ;;  %v1857_v5 = vsub.f32 %v1746_v44, %v1849_v3 }
 0x55d   : > { %3315 = vpow2.f32 %v1860_v4  ;;  %v1862_v6 = vmul.f32 1.442695, %v1857_v5 }
 0x55e   : > { %v1239_v7 = vpop.permute.xlu1 %1238 }
 0x55f   : > { %3317 = vpow2.f32 %v1862_v6  ;;  %v1284_v11 = vrot.slane %v1239_v7, %v4743_v32 }
 0x560   : > { %v1852_v8 = vpop.xlane.xlu0 %1851 }
 0x561   : > { %v1858_v9 = vsub.f32 %v1792_v51, %v1852_v8 }
 0x562   : > { %v1243_v10 = vpop.permute.xlu1 %1242 }
 0x563   : > { %v1864_v12 = vmul.f32 1.442695, %v1858_v9  ;;  %v1292_v13 = vrot.slane %v1243_v10, %v4743_v32 }
 0x564   : > { %v1855_v14 = vpop.xlane.xlu0 %1854 }
 0x565   : > { %3319 = vpow2.f32 %v1864_v12  ;;  %v1293_v15 = vcombine.low %v1284_v11, %v1292_v13  ;;  %v1859_v16 = vsub.f32 %v1838_v55, %v1855_v14  ;;  %v1294_v18 = vcombine.high %v1284_v11, %v1292_v13 }
 0x567   : > { %v4820_v17 = vpop.eup %3315  ;;  %v1866_v19 = vmul.f32 1.442695, %v1859_v16  ;;  %v1301_v23 = vrot.slane %v1293_v15, %v4746_v36  ;;  %v1308_v27 = vrot.slane %v1294_v18, %v4746_v36 }
 0x568   : > { %v1241_v20 = vpop.permute.xlu0 %1240  ;;  %v1868_v21 = vsel %vm1659_vm3, %v4820_v17, 0.0 }
 0x569   : > { %v4824_v22 = vpop.eup %3317  ;;  %1869 = vadd.xlane.f32.xlu1 %v1868_v21  ;;  %3321 = vpow2.f32 %v1866_v19  ;;  %v1258_v25 = vrot.slane %v1241_v20, %v4743_v32  ;;  %v1309_v30 = vcombine.high %v1301_v23, %v4021_v45  ;;  %v1310_v35 = vcombine.high %v1308_v27, %v4021_v45 }
 0x56a   : > { %v1871_v26 = vsel %vm1659_vm3, %v4824_v22, 0.0  ;;  %v1316_v37 = vshrl.u32 %v1301_v23, 16  ;;  %v1332_v38 = vshrl.u32 %v1308_v27, 16 }
 0x56b   : > { %1872 = vadd.xlane.f32.xlu0 %v1871_v26  ;;  %v1259_v28 = vcombine.low %v1250_v24, %v1258_v25  ;;  %v1260_v29 = vcombine.high %v1250_v24, %v1258_v25  ;;  %v1324_v43 = vshrl.u32 %v1309_v30, 16  ;;  %v1340_v52 = vshrl.u32 %v1310_v35, 16 }
 0x56d   : > { %v1267_v31 = vrot.slane %v1259_v28, %v4746_v36  ;;  %v1274_v33 = vrot.slane %v1260_v29, %v4746_v36 }
 0x56f   : > { %v4835_v34 = vpop.eup %3319  ;;  %v1275_v39 = vcombine.high %v1267_v31, %v4021_v45  ;;  %v1276_v40 = vcombine.high %v1274_v33, %v4021_v45  ;;  %v1313_v41 = vpack.i.b16 %v1301_v23, %v1267_v31  ;;  %v1315_v42 = vshrl.u32 %v1267_v31, 16 }
 0x570   : > { %v1329_v44 = vpack.i.b16 %v1308_v27, %v1274_v33  ;;  %v1331_v46 = vshrl.u32 %v1274_v33, 16  ;;  %v1874_v47 = vsel %vm1659_vm3, %v4835_v34, 0.0 }
 0x571   : > { %v1317_v48 = vpack.i.b16 %v1316_v37, %v1315_v42  ;;  %v1321_v49 = vpack.i.b16 %v1309_v30, %v1275_v39  ;;  %v1323_v50 = vshrl.u32 %v1275_v39, 16  ;;  %v1337_v51 = vpack.i.b16 %v1310_v35, %v1276_v40  ;;  %1875 = vadd.xlane.f32.xlu0 %v1874_v47 }
 0x572   : > { %v1333_v53 = vpack.i.b16 %v1332_v38, %v1331_v46  ;;  %v1339_v54 = vshrl.u32 %v1276_v40, 16  ;;  %v1343_v55 = vcombine.low %v1313_v41, %v1329_v44  ;;  %v3307_v46 = vld [vmem:[#allocation19] sm:$0xff]  }
 0x573   : > { %v4842_v56 = vpop.eup %3321  ;;  %v1325_v57 = vpack.i.b16 %v1324_v43, %v1323_v50  ;;  %v1351_v58 = vcombine.low %v1321_v49, %v1337_v51 }
 0x574   : > { %v1341_v59 = vpack.i.b16 %v1340_v52, %v1339_v54  ;;  %v1368_v60 = vcombine.low %v1317_v48, %v1333_v53  ;;  %v1877_v61 = vsel %vm1659_vm3, %v4842_v56, 0.0  ;;  %v1350_v62 = vrot.slane %v1343_v55, %v4743_v32 }
 0x575   : > { %v1358_v63 = vrot.slane %v1351_v58, %v4743_v32  ;;  %1878 = vadd.xlane.f32.xlu1 %v1877_v61 }
 0x576   : > { %v1376_v1 = vcombine.low %v1325_v57, %v1341_v59  ;;  %v1375_v3 = vrot.slane %v1368_v60, %v4743_v32 }
 0x577   : > { %v1359_v2 = vcombine.low %v1350_v62, %v1358_v63 }
 0x578   : > { %v1383_v4 = vrot.slane %v1376_v1, %v4743_v32 }
 0x579   : > { %v1366_v5 = vrot.slane %v1359_v2, %v4746_v36 }
 0x57a   : > { %v1384_v6 = vcombine.low %v1375_v3, %v1383_v4 }
 0x57b   : > { %v1367_v7 = vcombine.high %v1366_v5, %v4021_v45  ;;  %v1397_v11 = vshrl.u32 %v1366_v5, 16 }
 0x57c   : > { %v1391_v8 = vrot.slane %v1384_v6, %v4746_v36 }
 0x57d   : > { %v1405_v15 = vshrl.u32 %v1367_v7, 16 }
 0x57e   : > { %v1392_v9 = vcombine.high %v1391_v8, %v4021_v45  ;;  %v1395_v10 = vpack.i.b16 %v1391_v8, %v1366_v5  ;;  %v1398_v12 = vshrl.u32 %v1391_v8, 16 }
 0x580   : > { %v1399_v13 = vpack.i.b16 %v1398_v12, %v1397_v11  ;;  %v1403_v14 = vpack.i.b16 %v1392_v9, %v1367_v7  ;;  %v1406_v16 = vshrl.u32 %v1392_v9, 16  ;;  %1409 = vst.msk [vmem:[#allocation3] sm:$0xf] %vm1231_vm2, %v1395_v10 }
 0x582   : > { %v1407_v18 = vpack.i.b16 %v1406_v16, %v1405_v15  ;;  %1410 = vst.msk [vmem:[#allocation3 + $0x4] sm:$0xf] %vm1231_vm2, %v1399_v13  ;;  %1411 = vst.msk [vmem:[#allocation3 + $0x8] sm:$0xf] %vm1231_vm2, %v1403_v14 }
 0x584   : > { %1412 = vst.msk [vmem:[#allocation3 + $0xc] sm:$0xf] %vm1231_vm2, %v1407_v18 }
 0x587   : > { %v1892_v19 = vld [vmem:[#allocation3] sm:$0xf] }
 0x588   : > { %v1901_v20 = vsel %vm1899_vm4, %v1892_v19, 0 }
 0x589   : > { %3004 = vmatpush3.bf16.msra.mxu1 %v1901_v20  ;;  %v1893_v21 = vld [vmem:[#allocation3 + $0x4] sm:$0xf]  ;;  %v1894_v31 = vld [vmem:[#allocation3 + $0x8] sm:$0xf] }
 0x58a   : > { %v1947_v23 = vsel %vm1899_vm4, %v1893_v21, 0  ;;  %3015 = vmatprep.subr.bf16.mxu1 %v4014_v0  ;;  %v1993_v38 = vsel %vm1899_vm4, %v1894_v31, 0 }
 0x58b   : > { %3010 = vmatpush3.bf16.msra.mxu0 %v1947_v23  ;;  %v1895_v37 = vld [vmem:[#allocation3 + $0xc] sm:$0xf] }
 0x58c   : > { %3021 = vmatprep.subr.bf16.mxu0 %v4014_v0 }
 0x5f6   : > { %v1870_v24 = vpop.xlane.xlu1 %1869 }
 0x5f7   : > { %3323 = vrcp.f32 %v1870_v24 }
 0x5f8   : > { %v1873_v25 = vpop.xlane.xlu0 %1872 }
 0x5f9   : > { %3325 = vrcp.f32 %v1873_v25 }
 0x5fe   : > { %v1876_v26 = vpop.xlane.xlu0 %1875 }
 0x5ff   : > { %3327 = vrcp.f32 %v1876_v26 }
 0x601   : > { %v3324_v27 = vpop.eup %3323 }
 0x602   : > { %v1884_v28 = vmul.f32 %v3324_v27, %v4820_v17  ;;  %v1879_v30 = vpop.xlane.xlu1 %1878  ;;  %v2039_v17 = vsel %vm1899_vm4, %v1895_v37, 0 }
 0x603   : > { %v3326_v29 = vpop.eup %3325  ;;  %3329 = vrcp.f32 %v1879_v30 }
 0x604   : > { %v1885_v33 = vmul.f32 %v3326_v29, %v4824_v22  ;;  %v1888_v35 = vpack.c.bf16 %v1884_v28, %v1884_v28 }
 0x606   : > { %3006 = vmatmul.mubr.msk.bf16.vlgmr.msra.gmra.mrb[12].mxu1 %vm1659_vm3, %v1888_v35  ;;  %v1889_v39 = vpack.c.bf16 %v1885_v33, %v1885_v33 }
 0x607   : > { %3016 = vmatpush3.bf16.msra.mxu1 %v1993_v38  ;;  %3017 = vmatprep.mubr.msk.bf16.mxu1 %vm4015_vm0, %v4014_v0 }
 0x608   : > { %3012 = vmatmul.mubr.msk.bf16.vlgmr.msra.gmra.mrb[16].mxu0 %vm1659_vm3, %v1889_v39  ;;  %3027 = vmatprep.subr.bf16.mxu1 %v4014_v0 }
 0x609   : > { %3022 = vmatpush3.bf16.msra.mxu0 %v2039_v17  ;;  %3023 = vmatprep.mubr.msk.bf16.mxu0 %vm4015_vm0, %v4014_v0  ;;  %v3328_v22 = vpop.eup %3327 }
 0x60a   : > { %3035 = vmatprep.subr.bf16.mxu0 %v4014_v0  ;;  %v1886_v40 = vmul.f32 %v3328_v22, %v4835_v34 }
 0x60c   : > { %v1890_v41 = vpack.c.bf16 %v1886_v40, %v1886_v40 }
 0x60d   : > { %v3330_v42 = vpop.eup %3329 }
 0x60e   : > { %v1887_v43 = vmul.f32 %v3330_v42, %v4842_v56  ;;  %3018 = vmatmul.mubr.msk.bf16.vlgmr.msra.gmra.mrb[16].mxu1 %vm1659_vm3, %v1890_v41 }
 0x60f   : > { %3031 = vmatprep.mubr.msk.bf16.mxu1 %vm4015_vm0, %v4014_v0  ;;  %3028 = vmatpush3.bf16.msra.mxu1 %v3307_v46 }
 0x610   : > { %v1891_v44 = vpack.c.bf16 %v1887_v43, %v1887_v43  ;;  %3029 = vmatprep.subr.bf16.mxu1 %v4014_v0 }
 0x612   : > { %3024 = vmatmul.mubr.msk.bf16.vlgmr.msra.gmra.mrb[20].mxu0 %vm1659_vm3, %v1891_v44  ;;  %v3308_v44 = vld [vmem:[#allocation19 + $0x8] sm:$0xff]  }
 0x613   : > { %3039 = vmatprep.mubr.msk.bf16.mxu0 %vm4015_vm0, %v4014_v0  ;;  %3030 = vmatpush3.bf16.msra.mxu1 %v3308_v44 }
 0x614   : > { %3043 = vmatprep.subr.bf16.mxu1 %v4014_v0 }
 0x6d9   : > { %v1937_v34 = vpop.f32.mrb[12].mxu1 }
 0x6da   : > { %v3007_v47 = vpop.f32.mrb[13].mxu1  ;;  %v2081_v54 = vpack.c.bf16 %v1937_v34, %v1937_v34 }
 0x6db   : > { %v1940_v48 = vpop.f32.mrb[14].mxu1  ;;  %v1983_v49 = vpop.f32.mrb[16].mxu0 }
 0x6dc   : > { %v3008_v50 = vpop.f32.mrb[15].mxu1  ;;  %v3013_v51 = vpop.f32.mrb[17].mxu0  ;;  %v2088_v59 = vrot.slane %v2081_v54, %v4743_v32  ;;  %v2115_v62 = vpack.c.bf16 %v1983_v49, %v1983_v49 }
 0x6dd   : > { %v1986_v52 = vpop.f32.mrb[18].mxu0 }
 0x6de   : > { %v3014_v53 = vpop.f32.mrb[19].mxu0  ;;  %v2122_v9 = vrot.slane %v2115_v62, %v4743_v32 }
 0x6e1   : > { %v2029_v55 = vpop.f32.mrb[16].mxu1 }
 0x6e2   : > { %v2089_v56 = vpack.c.bf16 %v2029_v55, %v2029_v55  ;;  %v3019_v57 = vpop.f32.mrb[17].mxu1 }
 0x6e3   : > { %v2032_v58 = vpop.f32.mrb[18].mxu1 }
 0x6e4   : > { %v2096_v60 = vrot.slane %v2089_v56, %v4743_v32  ;;  %v3020_v61 = vpop.f32.mrb[19].mxu1 }
 0x6e5   : > { %v2075_v63 = vpop.f32.mrb[20].mxu0 }
 0x6e6   : > { %v2097_v1 = vcombine.low %v2088_v59, %v2096_v60  ;;  %v2098_v2 = vcombine.high %v2088_v59, %v2096_v60  ;;  %v2123_v3 = vpack.c.bf16 %v2075_v63, %v2075_v63  ;;  %v3025_v4 = vpop.f32.mrb[21].mxu0 }
 0x6e7   : > { %v2078_v5 = vpop.f32.mrb[22].mxu0 }
 0x6e8   : > { %v2105_v6 = vrot.slane %v2097_v1, %v4746_v36  ;;  %v2130_v7 = vrot.slane %v2123_v3, %v4743_v32  ;;  %v3026_v8 = vpop.f32.mrb[23].mxu0  ;;  %v2112_v10 = vrot.slane %v2098_v2, %v4746_v36  ;;  %v2897_v1 = vld [vmem:[#allocation21] ss:$0 sm:$0xff] }
 0x6e9   : > { %v2323_v3 = vld [vmem:[%s4665_s10] sm:$0xff]  ;;  %s5118_s10 = sld [smem:[#allocation71_spill]] }
 0x6ea   : > { %v2131_v11 = vcombine.low %v2122_v9, %v2130_v7  ;;  %v2132_v12 = vcombine.high %v2122_v9, %v2130_v7  ;;  %v2113_v13 = vcombine.high %v2105_v6, %v4021_v45  ;;  %v2114_v16 = vcombine.high %v2112_v10, %v4021_v45 }
 0x6eb   : > { %v2153_v18 = vshrl.u32 %v2105_v6, 16  ;;  %v2169_v25 = vshrl.u32 %v2112_v10, 16 }
 0x6ec   : > { %v2139_v14 = vrot.slane %v2131_v11, %v4746_v36  ;;  %v2146_v15 = vrot.slane %v2132_v12, %v4746_v36  ;;  %v2161_v24 = vshrl.u32 %v2113_v13, 16  ;;  %v2177_v33 = vshrl.u32 %v2114_v16, 16 }
 0x6ee   : > { %v2147_v19 = vcombine.high %v2139_v14, %v4021_v45  ;;  %v2148_v20 = vcombine.high %v2146_v15, %v4021_v45  ;;  %v2151_v21 = vpack.i.b16 %v2139_v14, %v2105_v6  ;;  %v2154_v23 = vshrl.u32 %v2139_v14, 16 }
 0x6ef   : > { %v2167_v26 = vpack.i.b16 %v2146_v15, %v2112_v10  ;;  %v2170_v27 = vshrl.u32 %v2146_v15, 16  ;;  %v3309_v15 = vld [vmem:[#allocation22] sm:$0xff]   ;;  %s4924_s11 = scalar_lea.hbm %s5118_s10, %s2916_s17 }
 0x6f0   : > { %v2155_v28 = vpack.i.b16 %v2154_v23, %v2153_v18  ;;  %v2159_v29 = vpack.i.b16 %v2147_v19, %v2113_v13  ;;  %v2162_v30 = vshrl.u32 %v2147_v19, 16  ;;  %v2175_v31 = vpack.i.b16 %v2148_v20, %v2114_v16  ;;  %3036 = vmatpush3.bf16.msra.mxu0 %v3309_v15  ;;  %v3310_v16 = vld [vmem:[#allocation22 + $0x8] sm:$0xff]   ;;  %v3311_v18 = vld [vmem:[#allocation25] sm:$0xff]   ;;  %v3312_v19 = vld [vmem:[#allocation25 + $0x8] sm:$0xff]  }
 0x6f1   : > { %v2171_v35 = vpack.i.b16 %v2170_v27, %v2169_v25  ;;  %v2178_v37 = vshrl.u32 %v2148_v20, 16  ;;  %v2181_v38 = vcombine.low %v2151_v21, %v2167_v26  ;;  %3037 = vmatprep.subr.bf16.mxu0 %v4014_v0  ;;  %v2901_v25 = vld [vmem:[#allocation28] ss:$0 sm:$0xff]  ;;  %v2902_v27 = vld [vmem:[#allocation30] ss:$0 sm:$0xff] }
 0x6f2   : > { %v2163_v39 = vpack.i.b16 %v2162_v30, %v2161_v24  ;;  %v2189_v17 = vcombine.low %v2159_v29, %v2175_v31  ;;  %v3313_v31 = vld [vmem:[#allocation25 + $0x10] sm:$0xff]  }
 0x6f3   : > { %v2179_v22 = vpack.i.b16 %v2178_v37, %v2177_v33  ;;  %v2206_v40 = vcombine.low %v2155_v28, %v2171_v35  ;;  %v2188_v41 = vrot.slane %v2181_v38, %v4743_v32  ;;  %v3314_v33 = vld [vmem:[#allocation25 + $0x18] sm:$0xff]  }
 0x6f4   : > { %v2196_v42 = vrot.slane %v2189_v17, %v4743_v32  ;;  %3038 = vmatpush3.bf16.msra.mxu0 %v3310_v16  ;;  %v2903_v35 = vld [vmem:[#allocation24] ss:$0 sm:$0xff] }
 0x6f5   : > { %v2214_v43 = vcombine.low %v2163_v39, %v2179_v22  ;;  %v2213_v34 = vrot.slane %v2206_v40, %v4743_v32 }
 0x6f6   : > { %v2197_v46 = vcombine.low %v2188_v41, %v2196_v42  ;;  %v2907_v42 = vld [vmem:[#allocation27] ss:$0 sm:$0xff] }
 0x6f7   : > { %v2221_v47 = vrot.slane %v2214_v43, %v4743_v32 }
 0x6f8   : > { %v2204_v48 = vrot.slane %v2197_v46, %v4746_v36 }
 0x6f9   : > { %v2222_v49 = vcombine.low %v2213_v34, %v2221_v47 }
 0x6fa   : > { %v2205_v51 = vcombine.high %v2204_v48, %v4021_v45  ;;  %v2234_v52 = vshrl.u32 %v2204_v48, 16 }
 0x6fb   : > { %v2229_v50 = vrot.slane %v2222_v49, %v4746_v36 }
 0x6fc   : > { %v2240_v58 = vshrl.u32 %v2205_v51, 16 }
 0x6fd   : > { %v2235_v53 = vshrl.u32 %v2229_v50, 16  ;;  %v2230_v54 = vcombine.high %v2229_v50, %v4021_v45  ;;  %v2233_v55 = vpack.i.b16 %v2229_v50, %v2204_v48 }
 0x6ff   : > { %v2236_v56 = vpack.i.b16 %v2235_v53, %v2234_v52  ;;  %v2239_v57 = vpack.i.b16 %v2230_v54, %v2205_v51  ;;  %v2241_v59 = vshrl.u32 %v2230_v54, 16 }
 0x701   : > { %2243 = vrot.lane.b32.xlu0 %v2236_v56, %s4022_s22  ;;  %2245 = vrot.lane.b32.xlu1 %v2239_v57, %s4023_s20  ;;  %v2242_v32 = vpack.i.b16 %v2241_v59, %v2240_v58  ;;  %v2913_v58 = vld [vmem:[#allocation31] ss:$0 sm:$0xff] }
 0x705   : > { %2247 = vrot.lane.b32.xlu1 %v2242_v32, %s4024_s12  ;;  %v2914_v32 = vld [vmem:[#allocation33] ss:$0 sm:$0xff] }
 0x773   : > { %v2244_v36 = vpop.permute.xlu0 %2243  ;;  %v2246_v60 = vpop.permute.xlu1 %2245 }
 0x774   : > { %v2251_v61 = vsel %vm1659_vm3, %v2233_v55, %v2244_v36 }
 0x775   : > { %v2254_v45 = vsel %vm2252_vm5, %v2251_v61, %v2246_v60 }
 0x777   : > { %v2248_v62 = vpop.permute.xlu1 %2247 }
 0x778   : > { %v2257_v63 = vsel %vm2255_vm6, %v2254_v45, %v2248_v62 }
 0x779   : > { %3032 = vmatmul.mubr.msk.bf16.vlgmr.msra.gmra.mrb[20].mxu1 %vm947_vm1, %v2257_v63 }
 0x77a   : > { %3051 = vmatprep.mubr.msk.bf16.mxu1 %vm4015_vm0, %v4014_v0  ;;  %3044 = vmatpush3.bf16.msra.mxu1 %v3311_v18 }
 0x77b   : > { %3045 = vmatprep.subr.bf16.mxu1 %v4014_v0 }
 0x77e   : > { %3046 = vmatpush3.bf16.msra.mxu1 %v3312_v19 }
 0x77f   : > { %3047 = vmatprep.subr.bf16.mxu1 %v4014_v0 }
 0x782   : > { %3048 = vmatpush3.bf16.msra.mxu1 %v3313_v31 }
 0x783   : > { %3049 = vmatprep.subr.bf16.mxu1 %v4014_v0 }
 0x786   : > { %3050 = vmatpush3.bf16.msra.mxu1 %v3314_v33 }
 0x84c   : > { %v2317_v2 = vpop.f32.mrb[20].mxu1 }
 0x84d   : > { %v2318_v4 = vadd.f32 %v2897_v1, %v2317_v2  ;;  %v3033_v5 = vpop.f32.mrb[21].mxu1 }
 0x84e   : > { %v2320_v6 = vpop.f32.mrb[22].mxu1 }
 0x84f   : > { %v3034_v7 = vpop.f32.mrb[23].mxu1  ;;  %v2324_v8 = vadd.f32 %v2323_v3, %v2318_v4 }
 0x851   : > { %v2325_v9 = vsel %vm947_vm1, %v2324_v8, 0.0 }
 0x852   : > { %2326 = vadd.xlane.f32.xlu0 %v2325_v9 }
 0x8df   : > { %v2327_v10 = vpop.xlane.xlu0 %2326 }
 0x8e0   : > { %v2329_v11 = vmul.f32 0.03125, %v2327_v10 }
 0x8e2   : > { %v2330_v12 = vsub.f32 %v2324_v8, %v2329_v11 }
 0x8e4   : > { %v2331_v13 = vmul.f32 %v2330_v12, %v2330_v12 }
 0x8e6   : > { %v2332_v14 = vsel %vm947_vm1, %v2331_v13, 0.0 }
 0x8e7   : > { %2333 = vadd.xlane.f32.xlu1 %v2332_v14 }
 0x974   : > { %v2334_v20 = vpop.xlane.xlu1 %2333 }
 0x975   : > { %v2335_v21 = vmul.f32 0.03125, %v2334_v20 }
 0x977   : > { %v2336_v23 = vadd.f32 1e-05, %v2335_v21 }
 0x979   : > { %3331 = vrsqrt.f32 %v2336_v23 }
 0x983   : > { %v3332_v24 = vpop.eup %3331 }
 0x984   : > { %v2338_v26 = vmul.f32 %v3332_v24, %v2330_v12 }
 0x986   : > { %v2346_v28 = vmul.f32 %v2901_v25, %v2338_v26 }
 0x988   : > { %v2354_v29 = vadd.f32 %v2902_v27, %v2346_v28 }
 0x98a   : > { %v2355_v30 = vpack.c.bf16 %v2354_v29, %v2354_v29 }
 0x98c   : > { %3040 = vmatmul.mubr.msk.bf16.vlgmr.msra.gmra.mrb[24].mxu0 %vm947_vm1, %v2355_v30 }
 0xa5f   : > { %v2416_v37 = vpop.f32.mrb[24].mxu0 }
 0xa60   : > { %v2417_v38 = vadd.f32 %v2903_v35, %v2416_v37  ;;  %v3041_v39 = vpop.f32.mrb[25].mxu0 }
 0xa61   : > { %v2419_v17 = vpop.f32.mrb[26].mxu0 }
 0xa62   : > { %v2422_v22 = vmax.f32 %v2417_v38, 0.0  ;;  %v3042_v40 = vpop.f32.mrb[27].mxu0 }
 0xa64   : > { %v2423_v41 = vpack.c.bf16 %v2422_v22, %v2422_v22 }
 0xa66   : > { %3052 = vmatmul.mubr.msk.bf16.vlgmr.msra.gmra.mrb[24].mxu1 %vm2463_vm7, %v2423_v41 }
 0xb39   : > { %v2501_v43 = vpop.f32.mrb[24].mxu1 }
 0xb3a   : > { %v2502_v44 = vadd.f32 %v2907_v42, %v2501_v43  ;;  %v3053_v46 = vpop.f32.mrb[25].mxu1 }
 0xb3b   : > { %v2504_v34 = vpop.f32.mrb[26].mxu1 }
 0xb3c   : > { %v3054_v47 = vpop.f32.mrb[27].mxu1  ;;  %v2507_v48 = vadd.f32 %v2502_v44, %v2354_v29 }
 0xb3e   : > { %v2508_v0 = vsel %vm947_vm1, %v2507_v48, 0.0 }
 0xb3f   : > { %2509 = vadd.xlane.f32.xlu0 %v2508_v0 }
 0xbcc   : > { %v2510_v49 = vpop.xlane.xlu0 %2509 }
 0xbcd   : > { %v2511_v50 = vmul.f32 0.03125, %v2510_v49 }
 0xbcf   : > { %v2512_v51 = vsub.f32 %v2507_v48, %v2511_v50 }
 0xbd1   : > { %v2513_v52 = vmul.f32 %v2512_v51, %v2512_v51 }
 0xbd3   : > { %v2514_v53 = vsel %vm947_vm1, %v2513_v52, 0.0 }
 0xbd4   : > { %2515 = vadd.xlane.f32.xlu0 %v2514_v53 }
 0xc61   : > { %v2516_v54 = vpop.xlane.xlu0 %2515 }
 0xc62   : > { %v2517_v55 = vmul.f32 0.03125, %v2516_v54 }
 0xc64   : > { %v2518_v56 = vadd.f32 1e-05, %v2517_v55 }
 0xc66   : > { %3333 = vrsqrt.f32 %v2518_v56 }
 0xc70   : > { %v3334_v57 = vpop.eup %3333 }
 0xc71   : > { %v2520_v59 = vmul.f32 %v3334_v57, %v2512_v51 }
 0xc73   : > { %v2528_v36 = vmul.f32 %v2913_v58, %v2520_v59 }
 0xc75   : > { %v2536_v60 = vadd.f32 %v2914_v32, %v2528_v36 }
 0xc77   : > { %2537 = vst.msk [vmem:[%s917_s18] sm:$0xff] %vm947_vm1, %v2536_v60 }
 0xc78   : > { %3886 = shalt.err (!%p3883_p10)
}
 0xc79   : > { %s3887_s15 = scalar_lea.hbm %s4924_s11, 128  ;;  %s3891_s19 = scalar_lea.hbm %s5118_s10, 256 }
 0xc7a   : > { %p3888_p5 = scmp.ne.s32.totalorder %s4924_s11, %s3887_s15  ;;  %p3892_p6 = scmp.lt.u32.totalorder %s4924_s11, %s5118_s10 }
 0xc7b   : > { %p3893_p7 = scmp.lt.u32.totalorder %s3891_s19, %s3887_s15  ;;  %p3895_p13 = scmp.lt.u32.totalorder %s3887_s15, %s4924_s11 }
 0xc7c   : > { %p3889_p1 = pnand %p3888_p5, %p5119_p2 }
 0xc7d   : > { %p3894_p3 = por %p3893_p7, %p3892_p6 }
 0xc7e   : > { %p3890_p0 = pneg %p3889_p1 }
 0xc7f   : > { %p3896_p4 = por %p3895_p13, %p3894_p3 }
 0xc81   : > { %p3897_p8 = pnand %p3896_p4, %p3890_p0 }
 0xc83   : > { %3900 = shalt.err (!%p3897_p8)
}
 0xc84   : > { %3125 = dma.vmem_to_hbm [thread:$0]  (%p5119_p2), %s4926_s28, 128, %s4924_s11, %s2539_s24  }
 0xc85 PF: > { %s5120_s12 = sld [smem:[#allocation48_spill]]  ;;  %s2565_s5 = sand.u32 1, %s3971_s0  }
 0xc86   : > { %p5121_p12 = scmp.ne.s32.totalorder %s5076_s21, 0  ;;  %s2566_s17 = scalar_lea.sflag [#allocation6], %s2565_s5 }
 0xc8b   : > { %p5122_p11 = scmp.ge.s32.totalorder %s5120_s12, 2 }
 0xc8d   : > { %p3187_p9 = pnand %p5122_p11, %p5121_p12 }
 0xc8f   : > { %3966 = dma.done.wait (!%p3187_p9), %s2566_s17, 128  }
 0xc90   : > { %3968 = vsyncadd (!%p3187_p9), %s2566_s17, 4294967168  ;;  %s46_s22 = sadd.s32 1, %s5120_s12   ;;  %s5123_s18 = sld [smem:[#allocation46_spill]] }
 0xc91   : > { %p43_p10 = scmp.ge.s32.totalorder %s46_s22, 4   ;;  %s5124_s20 = sld [smem:[#allocation51_spill]] }
 0xc92   : > { %s5125_s6 = sld [smem:[#allocation50_spill]]  ;;  %s5126_s0 = smov %s3975_s30 }
 0xc93   : > { %s5128_s21 = smov %s3987_s1  ;;  %45 = sbr.rel (!%p43_p10) target bundleno = 37 (0x25), region = 234 }
 0xc96   : > { %s5127_s30 = smov %s5123_s18 }
 0xc98   : > { %s5129_s1 = smov %s5125_s6 }
 0xc9a   :  { %2571 = vsyncpa [#allocation5], 1 }
 0xc9b   :  { %2573 = vsyncpa [#allocation5 + $0x1], 1 }
 0xc9c   :  { %2574 = vsyncpa [#allocation8], 1 }
 0xc9d   :  { %2576 = vsyncpa [#allocation8 + $0x1], 1 }
 0xc9e   :  { %2577 = vsyncpa [#allocation11], 1 }
 0xc9f   :  { %2578 = vsyncpa [#allocation14], 1 }
 0xca0   :  { %2579 = vsyncpa [#allocation17], 1 }
 0xca1   :  { %2580 = vsyncpa [#allocation20], 1 }
 0xca2   :  { %2581 = vsyncpa [#allocation23], 1 }
 0xca3   :  { %2582 = vsyncpa [#allocation26], 1 }
 0xca4   :  { %2583 = vsyncpa [#allocation29], 1 }
 0xca5   :  { %2584 = vsyncpa [#allocation32], 1 }
 0xca6   :  { %2585 = vsyncpa [#allocation6], 1 }
 0xca7   :  { %2587 = vsyncpa [#allocation6 + $0x1], 1 }

</bundles_post_ra>
